<compile_context>
chip_gen: v6e
topology: v6e:2x2x1
jax: 0.10.0
libtpu: 0.0.40
codegen_flags: <defaults>
</compile_context>

<pallas_src>
import functools

import jax
import jax.numpy as jnp
from jax import lax
from jax.experimental import pallas as pl
from jax.experimental.pallas import tpu as pltpu


def _nonlocal_kernel(x_past_ref, x_curr_ref,
                     theta_w_ref, theta_b_ref,
                     phig_w_ref, phig_b_ref,
                     ln_gamma_ref, ln_beta_ref,
                     out_w_ref, out_b_ref,
                     z_ref,
                     theta_sc, m_sc, l_sc, acc_sc,
                     *, ln_eps, mxu_dtype):
    bb, Cc, Tc = x_curr_ref.shape
    _, Cp, _tpb = x_past_ref.shape
    L = theta_w_ref.shape[0]
    kv = pl.program_id(1)

    # ---- init (first T_past tile of this batch block): theta projection + softmax state.
    @pl.when(kv == 0)
    def _init():
        w_th = theta_w_ref[...]                       # (L, Cc)  mxu dtype, scale pre-folded
        b_th = theta_b_ref[...]                       # (L, 1)   f32, scale pre-folded
        for b in range(bb):
            xc = x_curr_ref[b].astype(mxu_dtype)      # (Cc, Tc)
            th = jnp.dot(w_th, xc, preferred_element_type=jnp.float32) + b_th   # (L, Tc)
            theta_sc[b] = th.T                        # (Tc, L) f32 — one small XLU transpose
        m_sc[...] = jnp.full(m_sc.shape, -jnp.inf, dtype=m_sc.dtype)
        l_sc[...] = jnp.zeros(l_sc.shape, dtype=l_sc.dtype)
        acc_sc[...] = jnp.zeros(acc_sc.shape, dtype=acc_sc.dtype)

    # ---- one T_past tile: fused phi/g projection + online-softmax accumulation.
    w_pg = phig_w_ref[...]                            # (2L, Cp) mxu dtype
    b_pg = phig_b_ref[...]                            # (2L, 1)  f32
    for b in range(bb):
        xp = x_past_ref[b]                            # (Cp, tpb) already mxu dtype (bf16-shipped)
        pg = jnp.dot(w_pg, xp, preferred_element_type=jnp.float32) + b_pg       # (2L, tpb)
        phi = pg[:L].astype(mxu_dtype)                # (L, tpb)
        g = pg[L:].astype(mxu_dtype)                  # (L, tpb)

        s = jnp.dot(theta_sc[b].astype(mxu_dtype), phi,
                    preferred_element_type=jnp.float32)                          # (Tc, tpb)
        m_prev = m_sc[b]                                                          # (Tc, 1)
        m_new = jnp.maximum(m_prev, jnp.max(s, axis=-1, keepdims=True))
        alpha = jnp.exp(m_prev - m_new)
        e = jnp.exp(s - m_new)                        # (Tc, tpb) f32, unnormalized
        l_sc[b] = alpha * l_sc[b] + jnp.sum(e, axis=-1, keepdims=True)
        # Deferred normalization: accumulate e @ g^T; divide by the row sum only once at the end.
        pv = lax.dot_general(e.astype(mxu_dtype), g,
                             dimension_numbers=(((1,), (1,)), ((), ())),
                             preferred_element_type=jnp.float32)                 # (Tc, L)
        acc_sc[b] = alpha * acc_sc[b] + pv
        m_sc[b] = m_new

    # ---- finalize (last T_past tile): softmax rescale, LayerNorm, ReLU, 1x1 conv, residual.
    @pl.when(kv == pl.num_programs(1) - 1)
    def _finalize():
        w_o = out_w_ref[...]                          # (Cc, L) mxu dtype
        b_o = out_b_ref[...]                          # (Cc, 1) f32
        gamma = ln_gamma_ref[...]                     # (L, Tc) f32
        beta = ln_beta_ref[...]                       # (L, Tc) f32
        inv_n = 1.0 / float(L * Tc)
        for b in range(bb):
            # Softmax rescale only touches the small (Tc, L) accumulator (EUP reciprocal).
            t = acc_sc[b] * pl.reciprocal(l_sc[b], approx=True)                  # (Tc, L)
            t_nct = t.T                                                          # (L, Tc) f32
            # LayerNorm over the whole (latent_dim, video_feat_dim) slab (two-pass mean/var).
            mu = jnp.sum(t_nct, axis=(0, 1), keepdims=True) * inv_n
            d = t_nct - mu
            var = jnp.sum(d * d, axis=(0, 1), keepdims=True) * inv_n
            t_ln = d * lax.rsqrt(var + ln_eps) * gamma + beta
            t_relu = jnp.maximum(t_ln, 0.0).astype(mxu_dtype)                    # (L, Tc)
            w_t = jnp.dot(w_o, t_relu, preferred_element_type=jnp.float32) + b_o  # (Cc, Tc)
            z_ref[b] = (w_t + x_curr_ref[b].astype(jnp.float32)).astype(z_ref.dtype)


def _pick_tp_block(t_past, cap):
    """Largest T_past tile that divides T_past and satisfies the NCT lane-dim BlockSpec
    constraint (multiple of 128, or the full axis)."""
    if t_past <= cap:
        return t_past
    c = (cap // 128) * 128
    while c >= 128:
        if t_past % c == 0:
            return c
        c -= 128
    return t_past


def nonlocal_block_1d(x_past, x_curr, params, *, scale=True, scale_factor_exp=-0.5,
                      batch_block=8, tp_block_cap=512, mxu_dtype=jnp.bfloat16, ln_eps=1e-5):
    """NONLocalBlock1D forward. x_past: (B, Cp, Tp); x_curr: (B, Cc, Tc) -> (B, Cc, Tc).
    NCT layout is kept end-to-end (no wrapper transposes, no batch padding)."""
    B, Cp, Tp = x_past.shape
    Bc, Cc, Tc = x_curr.shape
    assert Bc == B
    L = params["theta_w"].shape[0]

    mxu_size = jnp.dtype(mxu_dtype).itemsize
    io_size = jnp.dtype(x_curr.dtype).itemsize

    tpb = _pick_tp_block(Tp, tp_block_cap)
    grid_kv = Tp // tpb

    # Generation-aware VMEM budget: ~48 MiB-class on v7x (64 MiB physical), ~96 MiB on v5e/v6e.
    try:
        info = pltpu.get_tpu_info()
        vmem_cap = int(getattr(info, "vmem_capacity_bytes", 128 * 1024 * 1024))
    except Exception:
        vmem_cap = 128 * 1024 * 1024
    vmem_limit = min(int(0.75 * vmem_cap), 100 * 1024 * 1024)

    w_bytes = 2 * ((L * Cc + 2 * L * Cp + Cc * L) * mxu_size
                   + (L + 2 * L + Cc + 2 * L * Tc) * 4)          # double-buffered constants

    def _vmem_per_step(bb):
        act = 2 * bb * Cp * tpb * mxu_size                        # x_past double buffer
        act += 2 * bb * Cc * Tc * io_size                         # x_curr double buffer
        act += 2 * bb * Cc * Tc * io_size                         # output double buffer
        scr = 4 * bb * Tc * (2 * L + 2)                           # theta/acc/m/l f32 scratch
        tmp = 8 * (Tc * tpb + 2 * L * tpb + Tc * L + Cc * Tc)     # f32 temporaries, 2x headroom
        return act + scr + tmp + w_bytes

    # Batch block: largest divisor of B (no padding / wasted steps) fitting the VMEM budget.
    # NOT halved on single-TC chips (v5e/v6e); on v7x the "parallel" batch axis still
    # megacore-shards whenever B > bb.
    bb = 1
    budget = int(0.8 * vmem_limit)
    for cand in range(min(batch_block, B), 0, -1):
        if B % cand == 0 and _vmem_per_step(cand) <= budget:
            bb = cand
            break
    grid_b = B // bb

    # One-time parameter transforms: fold softmax scale into theta, fuse phi+g into one
    # (2L, Cp) projection, cast MXU weights to the MXU dtype.
    sf = (float(L) ** float(scale_factor_exp)) if scale else 1.0
    theta_w = (params["theta_w"] * sf).astype(mxu_dtype)                              # (L, Cc)
    theta_b = (params["theta_b"] * sf).reshape(L, 1).astype(jnp.float32)
    phig_w = jnp.concatenate([params["phi_w"], params["g_w"]], axis=0).astype(mxu_dtype)  # (2L, Cp)
    phig_b = jnp.concatenate([params["phi_b"], params["g_b"]],
                             axis=0).reshape(2 * L, 1).astype(jnp.float32)
    out_w = params["out_w"].astype(mxu_dtype)                                          # (Cc, L)
    out_b = params["out_b"].reshape(Cc, 1).astype(jnp.float32)
    ln_gamma = params["ln_gamma"].astype(jnp.float32)                                  # (L, Tc)
    ln_beta = params["ln_beta"].astype(jnp.float32)

    # x_past is the largest input stream: ship it pre-cast to the MXU dtype (halves HBM traffic).
    x_past_in = x_past.astype(mxu_dtype)

    kernel = functools.partial(_nonlocal_kernel, ln_eps=ln_eps, mxu_dtype=mxu_dtype)

    def _const(shape):
        return pl.BlockSpec(shape, lambda b, k: (0,) * len(shape))

    grid_spec = pltpu.PrefetchScalarGridSpec(
        num_scalar_prefetch=0,
        grid=(grid_b, grid_kv),
        in_specs=[
            pl.BlockSpec((bb, Cp, tpb), lambda b, k: (b, 0, k)),   # x_past (NCT, Tp-tiled)
            pl.BlockSpec((bb, Cc, Tc), lambda b, k: (b, 0, 0)),    # x_curr (NCT, revisited)
            _const((L, Cc)), _const((L, 1)),                       # theta (scale folded)
            _const((2 * L, Cp)), _const((2 * L, 1)),               # fused phi+g
            _const((L, Tc)), _const((L, Tc)),                      # LayerNorm gamma / beta
            _const((Cc, L)), _const((Cc, 1)),                      # final 1x1 conv
        ],
        out_specs=pl.BlockSpec((bb, Cc, Tc), lambda b, k: (b, 0, 0)),
        scratch_shapes=[
            pltpu.VMEM((bb, Tc, L), jnp.float32),   # theta (time-major), reused across Tp tiles
            pltpu.VMEM((bb, Tc, 1), jnp.float32),   # online-softmax running max
            pltpu.VMEM((bb, Tc, 1), jnp.float32),   # online-softmax running sum
            pltpu.VMEM((bb, Tc, L), jnp.float32),   # unnormalized attention-output accumulator
        ],
    )

    flops = 2 * B * (L * Cc * Tc + 2 * L * Cp * Tp + 2 * Tc * Tp * L + Cc * L * Tc)
    transcendentals = B * Tc * (Tp + 2)
    bytes_accessed = (B * Cp * Tp * mxu_size + 2 * B * Cc * Tc * io_size
                      + (L * Cc + 2 * L * Cp + Cc * L) * mxu_size + 2 * L * Tc * 4)

    return pl.pallas_call(
        kernel,
        out_shape=jax.ShapeDtypeStruct((B, Cc, Tc), x_curr.dtype),
        grid_spec=grid_spec,
        compiler_params=pltpu.CompilerParams(
            dimension_semantics=("parallel", "arbitrary"),
            vmem_limit_bytes=vmem_limit),
        cost_estimate=pl.CostEstimate(flops=flops, transcendentals=transcendentals,
                                      bytes_accessed=bytes_accessed),
    )(x_past_in, x_curr,
      theta_w, theta_b, phig_w, phig_b,
      ln_gamma, ln_beta, out_w, out_b)


def init_params(key, dim_curr, dim_past, latent_dim, video_feat_dim):
    """Init mirroring the module __init__: theta/phi/g weights ~ N(0, 0.01), biases 0;
    LayerNorm gamma=1, beta=0; final conv uses a small deterministic normal."""
    k1, k2, k3, k4 = jax.random.split(key, 4)
    f32 = jnp.float32
    return {
        "theta_w": 0.01 * jax.random.normal(k1, (latent_dim, dim_curr), f32),
        "theta_b": jnp.zeros((latent_dim,), f32),
        "phi_w": 0.01 * jax.random.normal(k2, (latent_dim, dim_past), f32),
        "phi_b": jnp.zeros((latent_dim,), f32),
        "g_w": 0.01 * jax.random.normal(k3, (latent_dim, dim_past), f32),
        "g_b": jnp.zeros((latent_dim,), f32),
        "ln_gamma": jnp.ones((latent_dim, video_feat_dim), f32),
        "ln_beta": jnp.zeros((latent_dim, video_feat_dim), f32),
        "out_w": 0.05 * jax.random.normal(k4, (dim_curr, latent_dim), f32),
        "out_b": jnp.zeros((dim_curr,), f32),
    }


def _reference(x_past, x_curr, params, *, scale=True, scale_factor_exp=-0.5, ln_eps=1e-5):
    """Pure-JAX reference matching the PyTorch forward (NCT layout)."""
    L = params["theta_w"].shape[0]
    theta = jnp.einsum('lc,bct->blt', params["theta_w"], x_curr) + params["theta_b"][None, :, None]
    phi = jnp.einsum('lc,bct->blt', params["phi_w"], x_past) + params["phi_b"][None, :, None]
    g = jnp.einsum('lc,bct->blt', params["g_w"], x_past) + params["g_b"][None, :, None]
    tp = jnp.einsum('blq,blk->bqk', theta, phi)
    if scale:
        tp = tp * (float(L) ** float(scale_factor_exp))
    p = jax.nn.softmax(tp, axis=-1)
    t = jnp.einsum('bqk,blk->blq', p, g)                          # (B, L, Tc)
    mu = jnp.mean(t, axis=(1, 2), keepdims=True)
    var = jnp.mean((t - mu) ** 2, axis=(1, 2), keepdims=True)
    tn = (t - mu) / jnp.sqrt(var + ln_eps) * params["ln_gamma"][None] + params["ln_beta"][None]
    tr = jnp.maximum(tn, 0.0)
    wt = jnp.einsum('cl,blt->bct', params["out_w"], tr) + params["out_b"][None, :, None]
    return wt + x_curr


if __name__ == "__main__":
    # Small, module-consistent shapes.
    B = 2
    dim_curr = 4          # in_dim1 / channels of x_curr and output
    dim_past = 6          # in_dim2 / channels of x_past
    latent_dim = 32
    video_feat_dim = 16   # must equal T_curr for LayerNorm([latent_dim, video_feat_dim])
    T_curr = video_feat_dim
    T_past = 8

    key = jax.random.PRNGKey(0)
    kx, kp, kw = jax.random.split(key, 3)
    x_curr = jax.random.normal(kx, (B, dim_curr, T_curr), jnp.float32)
    x_past = jax.random.normal(kp, (B, dim_past, T_past), jnp.float32)
    params = init_params(kw, dim_curr, dim_past, latent_dim, video_feat_dim)

    # Correctness check against the pure-JAX reference (f32 MXU path; loose tol for the
    # approx reciprocal in the softmax denominator).
    z_ref = jax.block_until_ready(_reference(x_past, x_curr, params))
    z_f32 = jax.block_until_ready(
        nonlocal_block_1d(x_past, x_curr, params, mxu_dtype=jnp.float32))
    assert z_f32.shape == (B, dim_curr, T_curr)
    assert bool(jnp.allclose(z_f32, z_ref, atol=1e-2, rtol=1e-2))

    # Default (bf16 MXU operands, f32 accumulation) run.
    z = jax.block_until_ready(nonlocal_block_1d(x_past, x_curr, params))
    assert z.shape == (B, dim_curr, T_curr)
    assert bool(jnp.all(jnp.isfinite(z)))
    print("KERNEL_OK")
</pallas_src>

<mosaic_0001>
module attributes {stable_mosaic.version = 11 : i64} {
  func.func @_nonlocal_kernel(%arg0: i32, %arg1: i32, %arg2: memref<2x6x8xf32, #tpu.memory_space<vmem>>, %arg3: memref<2x4x16xf32, #tpu.memory_space<vmem>>, %arg4: memref<32x4xf32, #tpu.memory_space<vmem>>, %arg5: memref<32x1xf32, #tpu.memory_space<vmem>>, %arg6: memref<64x6xf32, #tpu.memory_space<vmem>>, %arg7: memref<64x1xf32, #tpu.memory_space<vmem>>, %arg8: memref<32x16xf32, #tpu.memory_space<vmem>>, %arg9: memref<32x16xf32, #tpu.memory_space<vmem>>, %arg10: memref<4x32xf32, #tpu.memory_space<vmem>>, %arg11: memref<4x1xf32, #tpu.memory_space<vmem>>, %arg12: memref<2x4x16xf32, #tpu.memory_space<vmem>>, %arg13: memref<2x16x32xf32, #tpu.memory_space<vmem>>, %arg14: memref<2x16x1xf32, #tpu.memory_space<vmem>>, %arg15: memref<2x16x1xf32, #tpu.memory_space<vmem>>, %arg16: memref<2x16x32xf32, #tpu.memory_space<vmem>>) attributes {dimension_semantics = [#tpu.dimension_semantics<parallel>, #tpu.dimension_semantics<arbitrary>], iteration_bounds = array<i64: 1, 1>, scalar_prefetch = 0 : i64, scratch_operands = 4 : i64, tpu.core_type = #tpu.core_type<tc>, window_params = [{transform_indices = @transform_0, window_bounds = array<i64: 2, 6, 8>}, {transform_indices = @transform_1, window_bounds = array<i64: 2, 4, 16>}, {pipeline_mode = #tpu.pipeline_mode<synchronous>, transform_indices = @transform_2, window_bounds = array<i64: 32, 4>}, {pipeline_mode = #tpu.pipeline_mode<synchronous>, transform_indices = @transform_3, window_bounds = array<i64: 32, 1>}, {pipeline_mode = #tpu.pipeline_mode<synchronous>, transform_indices = @transform_4, window_bounds = array<i64: 64, 6>}, {pipeline_mode = #tpu.pipeline_mode<synchronous>, transform_indices = @transform_5, window_bounds = array<i64: 64, 1>}, {pipeline_mode = #tpu.pipeline_mode<synchronous>, transform_indices = @transform_6, window_bounds = array<i64: 32, 16>}, {pipeline_mode = #tpu.pipeline_mode<synchronous>, transform_indices = @transform_7, window_bounds = array<i64: 32, 16>}, {pipeline_mode = #tpu.pipeline_mode<synchronous>, transform_indices = @transform_8, window_bounds = array<i64: 4, 32>}, {pipeline_mode = #tpu.pipeline_mode<synchronous>, transform_indices = @transform_9, window_bounds = array<i64: 4, 1>}, {transform_indices = @transform_10, window_bounds = array<i64: 2, 4, 16>}]} {
    %c0_i32 = arith.constant 0 : i32
    %0 = arith.cmpi eq, %arg1, %c0_i32 : i32
    %1 = arith.extui %0 : i1 to i32
    %c0_i32_0 = arith.constant 0 : i32
    %2 = arith.cmpi ne, %1, %c0_i32_0 : i32
    scf.if %2 {
      %c0_62 = arith.constant 0 : index
      %c0_63 = arith.constant 0 : index
      %90 = vector.load %arg4[%c0_62, %c0_63] : memref<32x4xf32, #tpu.memory_space<vmem>>, vector<32x4xf32>
      %c0_64 = arith.constant 0 : index
      %c0_65 = arith.constant 0 : index
      %91 = vector.load %arg5[%c0_64, %c0_65] : memref<32x1xf32, #tpu.memory_space<vmem>>, vector<32x1xf32>
      %c0_66 = arith.constant 0 : index
      %c0_67 = arith.constant 0 : index
      %c0_68 = arith.constant 0 : index
      %92 = vector.load %arg3[%c0_66, %c0_67, %c0_68] : memref<2x4x16xf32, #tpu.memory_space<vmem>>, vector<1x4x16xf32>
      %93 = vector.shape_cast %92 : vector<1x4x16xf32> to vector<4x16xf32>
      %cst_69 = arith.constant dense<0.000000e+00> : vector<32x16xf32>
      %94 = tpu.matmul %90, %93, %cst_69 {dimension_numbers = #tpu.dot_dimension_numbers<[1], [0], [0], [1], [0, 0, 1, 1], [], []>} : vector<32x4xf32>, vector<4x16xf32>, vector<32x16xf32> -> vector<32x16xf32>
      %95 = vector.broadcast %91 : vector<32x1xf32> to vector<32x16xf32>
      %96 = arith.addf %94, %95 : vector<32x16xf32>
      %97 = tpu.transpose %96, [1, 0] : vector<32x16xf32> -> vector<16x32xf32>
      %c0_70 = arith.constant 0 : index
      %c0_71 = arith.constant 0 : index
      %c0_72 = arith.constant 0 : index
      %98 = vector.load %arg13[%c0_70, %c0_71, %c0_72] : memref<2x16x32xf32, #tpu.memory_space<vmem>>, vector<1x16x32xf32>
      %99 = vector.shape_cast %98 : vector<1x16x32xf32> to vector<16x32xf32>
      %100 = vector.shape_cast %97 : vector<16x32xf32> to vector<1x16x32xf32>
      tpu.vector_store %arg13[%c0_70, %c0_71, %c0_72], %100 {strides = array<i32>} : memref<2x16x32xf32, #tpu.memory_space<vmem>>, vector<1x16x32xf32>,
      %c1_73 = arith.constant 1 : index
      %c0_74 = arith.constant 0 : index
      %c0_75 = arith.constant 0 : index
      %101 = vector.load %arg3[%c1_73, %c0_74, %c0_75] : memref<2x4x16xf32, #tpu.memory_space<vmem>>, vector<1x4x16xf32>
      %102 = vector.shape_cast %101 : vector<1x4x16xf32> to vector<4x16xf32>
      %cst_76 = arith.constant dense<0.000000e+00> : vector<32x16xf32>
      %103 = tpu.matmul %90, %102, %cst_76 {dimension_numbers = #tpu.dot_dimension_numbers<[1], [0], [0], [1], [0, 0, 1, 1], [], []>} : vector<32x4xf32>, vector<4x16xf32>, vector<32x16xf32> -> vector<32x16xf32>
      %104 = vector.broadcast %91 : vector<32x1xf32> to vector<32x16xf32>
      %105 = arith.addf %103, %104 : vector<32x16xf32>
      %106 = tpu.transpose %105, [1, 0] : vector<32x16xf32> -> vector<16x32xf32>
      %c1_77 = arith.constant 1 : index
      %c0_78 = arith.constant 0 : index
      %c0_79 = arith.constant 0 : index
      %107 = vector.load %arg13[%c1_77, %c0_78, %c0_79] : memref<2x16x32xf32, #tpu.memory_space<vmem>>, vector<1x16x32xf32>
      %108 = vector.shape_cast %107 : vector<1x16x32xf32> to vector<16x32xf32>
      %109 = vector.shape_cast %106 : vector<16x32xf32> to vector<1x16x32xf32>
      tpu.vector_store %arg13[%c1_77, %c0_78, %c0_79], %109 {strides = array<i32>} : memref<2x16x32xf32, #tpu.memory_space<vmem>>, vector<1x16x32xf32>,
      %cst_80 = arith.constant 0xFF800000 : f32
      %110 = vector.broadcast %cst_80 : f32 to vector<2x16x1xf32>
      %c0_81 = arith.constant 0 : index
      %c0_82 = arith.constant 0 : index
      %c0_83 = arith.constant 0 : index
      %111 = vector.load %arg14[%c0_81, %c0_82, %c0_83] : memref<2x16x1xf32, #tpu.memory_space<vmem>>, vector<2x16x1xf32>
      tpu.vector_store %arg14[%c0_81, %c0_82, %c0_83], %110 {strides = array<i32>} : memref<2x16x1xf32, #tpu.memory_space<vmem>>, vector<2x16x1xf32>,
      %cst_84 = arith.constant 0.000000e+00 : f32
      %112 = vector.broadcast %cst_84 : f32 to vector<2x16x1xf32>
      %c0_85 = arith.constant 0 : index
      %c0_86 = arith.constant 0 : index
      %c0_87 = arith.constant 0 : index
      %113 = vector.load %arg15[%c0_85, %c0_86, %c0_87] : memref<2x16x1xf32, #tpu.memory_space<vmem>>, vector<2x16x1xf32>
      tpu.vector_store %arg15[%c0_85, %c0_86, %c0_87], %112 {strides = array<i32>} : memref<2x16x1xf32, #tpu.memory_space<vmem>>, vector<2x16x1xf32>,
      %cst_88 = arith.constant 0.000000e+00 : f32
      %114 = vector.broadcast %cst_88 : f32 to vector<2x16x32xf32>
      %c0_89 = arith.constant 0 : index
      %c0_90 = arith.constant 0 : index
      %c0_91 = arith.constant 0 : index
      %115 = vector.load %arg16[%c0_89, %c0_90, %c0_91] : memref<2x16x32xf32, #tpu.memory_space<vmem>>, vector<2x16x32xf32>
      tpu.vector_store %arg16[%c0_89, %c0_90, %c0_91], %114 {strides = array<i32>} : memref<2x16x32xf32, #tpu.memory_space<vmem>>, vector<2x16x32xf32>,
    } else {
    }
    %c0 = arith.constant 0 : index
    %c0_1 = arith.constant 0 : index
    %3 = vector.load %arg6[%c0, %c0_1] : memref<64x6xf32, #tpu.memory_space<vmem>>, vector<64x6xf32>
    %c0_2 = arith.constant 0 : index
    %c0_3 = arith.constant 0 : index
    %4 = vector.load %arg7[%c0_2, %c0_3] : memref<64x1xf32, #tpu.memory_space<vmem>>, vector<64x1xf32>
    %c0_4 = arith.constant 0 : index
    %c0_5 = arith.constant 0 : index
    %c0_6 = arith.constant 0 : index
    %5 = vector.load %arg2[%c0_4, %c0_5, %c0_6] : memref<2x6x8xf32, #tpu.memory_space<vmem>>, vector<1x6x8xf32>
    %6 = vector.shape_cast %5 : vector<1x6x8xf32> to vector<6x8xf32>
    %cst = arith.constant dense<0.000000e+00> : vector<64x8xf32>
    %7 = tpu.matmul %3, %6, %cst {dimension_numbers = #tpu.dot_dimension_numbers<[1], [0], [0], [1], [0, 0, 1, 1], [], []>} : vector<64x6xf32>, vector<6x8xf32>, vector<64x8xf32> -> vector<64x8xf32>
    %8 = vector.broadcast %4 : vector<64x1xf32> to vector<64x8xf32>
    %9 = arith.addf %7, %8 : vector<64x8xf32>
    %10 = vector.extract_strided_slice %9 {offsets = [0, 0], sizes = [32, 8], strides = [1, 1]} : vector<64x8xf32> to vector<32x8xf32>
    %11 = vector.extract_strided_slice %9 {offsets = [32, 0], sizes = [32, 8], strides = [1, 1]} : vector<64x8xf32> to vector<32x8xf32>
    %c0_7 = arith.constant 0 : index
    %c0_8 = arith.constant 0 : index
    %c0_9 = arith.constant 0 : index
    %12 = vector.load %arg13[%c0_7, %c0_8, %c0_9] : memref<2x16x32xf32, #tpu.memory_space<vmem>>, vector<1x16x32xf32>
    %13 = vector.shape_cast %12 : vector<1x16x32xf32> to vector<16x32xf32>
    %cst_10 = arith.constant dense<0.000000e+00> : vector<16x8xf32>
    %14 = tpu.matmul %13, %10, %cst_10 {dimension_numbers = #tpu.dot_dimension_numbers<[1], [0], [0], [1], [0, 0, 1, 1], [], []>} : vector<16x32xf32>, vector<32x8xf32>, vector<16x8xf32> -> vector<16x8xf32>
    %c0_11 = arith.constant 0 : index
    %c0_12 = arith.constant 0 : index
    %c0_13 = arith.constant 0 : index
    %15 = vector.load %arg14[%c0_11, %c0_12, %c0_13] : memref<2x16x1xf32, #tpu.memory_space<vmem>>, vector<1x16x1xf32>
    %16 = vector.shape_cast %15 : vector<1x16x1xf32> to vector<16x1xf32>
    %cst_14 = arith.constant dense<0xFF800000> : vector<16xf32>
    %17 = vector.multi_reduction <maximumf>, %14, %cst_14 [1] : vector<16x8xf32> to vector<16xf32>
    %18 = vector.shape_cast %17 : vector<16xf32> to vector<16x1xf32>
    %19 = arith.maximumf %16, %18 : vector<16x1xf32>
    %20 = arith.subf %16, %19 : vector<16x1xf32>
    %21 = math.exp %20 : vector<16x1xf32>
    %22 = vector.broadcast %19 : vector<16x1xf32> to vector<16x8xf32>
    %23 = arith.subf %14, %22 : vector<16x8xf32>
    %24 = math.exp %23 : vector<16x8xf32>
    %c0_15 = arith.constant 0 : index
    %c0_16 = arith.constant 0 : index
    %c0_17 = arith.constant 0 : index
    %25 = vector.load %arg15[%c0_15, %c0_16, %c0_17] : memref<2x16x1xf32, #tpu.memory_space<vmem>>, vector<1x16x1xf32>
    %26 = vector.shape_cast %25 : vector<1x16x1xf32> to vector<16x1xf32>
    %27 = arith.mulf %21, %26 : vector<16x1xf32>
    %cst_18 = arith.constant dense<0.000000e+00> : vector<16xf32>
    %28 = vector.multi_reduction <add>, %24, %cst_18 [1] : vector<16x8xf32> to vector<16xf32>
    %29 = vector.shape_cast %28 : vector<16xf32> to vector<16x1xf32>
    %30 = arith.addf %27, %29 : vector<16x1xf32>
    %c0_19 = arith.constant 0 : index
    %c0_20 = arith.constant 0 : index
    %c0_21 = arith.constant 0 : index
    %31 = vector.load %arg15[%c0_19, %c0_20, %c0_21] : memref<2x16x1xf32, #tpu.memory_space<vmem>>, vector<1x16x1xf32>
    %32 = vector.shape_cast %31 : vector<1x16x1xf32> to vector<16x1xf32>
    %33 = vector.shape_cast %30 : vector<16x1xf32> to vector<1x16x1xf32>
    tpu.vector_store %arg15[%c0_19, %c0_20, %c0_21], %33 {strides = array<i32>} : memref<2x16x1xf32, #tpu.memory_space<vmem>>, vector<1x16x1xf32>,
    %cst_22 = arith.constant dense<0.000000e+00> : vector<16x32xf32>
    %34 = tpu.matmul %24, %11, %cst_22 {dimension_numbers = #tpu.dot_dimension_numbers<[1], [1], [0], [0], [0, 0, 1, 0], [], []>} : vector<16x8xf32>, vector<32x8xf32>, vector<16x32xf32> -> vector<16x32xf32>
    %c0_23 = arith.constant 0 : index
    %c0_24 = arith.constant 0 : index
    %c0_25 = arith.constant 0 : index
    %35 = vector.load %arg16[%c0_23, %c0_24, %c0_25] : memref<2x16x32xf32, #tpu.memory_space<vmem>>, vector<1x16x32xf32>
    %36 = vector.shape_cast %35 : vector<1x16x32xf32> to vector<16x32xf32>
    %37 = vector.broadcast %21 : vector<16x1xf32> to vector<16x32xf32>
    %38 = arith.mulf %37, %36 : vector<16x32xf32>
    %39 = arith.addf %38, %34 : vector<16x32xf32>
    %c0_26 = arith.constant 0 : index
    %c0_27 = arith.constant 0 : index
    %c0_28 = arith.constant 0 : index
    %40 = vector.load %arg16[%c0_26, %c0_27, %c0_28] : memref<2x16x32xf32, #tpu.memory_space<vmem>>, vector<1x16x32xf32>
    %41 = vector.shape_cast %40 : vector<1x16x32xf32> to vector<16x32xf32>
    %42 = vector.shape_cast %39 : vector<16x32xf32> to vector<1x16x32xf32>
    tpu.vector_store %arg16[%c0_26, %c0_27, %c0_28], %42 {strides = array<i32>} : memref<2x16x32xf32, #tpu.memory_space<vmem>>, vector<1x16x32xf32>,
    %c0_29 = arith.constant 0 : index
    %c0_30 = arith.constant 0 : index
    %c0_31 = arith.constant 0 : index
    %43 = vector.load %arg14[%c0_29, %c0_30, %c0_31] : memref<2x16x1xf32, #tpu.memory_space<vmem>>, vector<1x16x1xf32>
    %44 = vector.shape_cast %43 : vector<1x16x1xf32> to vector<16x1xf32>
    %45 = vector.shape_cast %19 : vector<16x1xf32> to vector<1x16x1xf32>
    tpu.vector_store %arg14[%c0_29, %c0_30, %c0_31], %45 {strides = array<i32>} : memref<2x16x1xf32, #tpu.memory_space<vmem>>, vector<1x16x1xf32>,
    %c1 = arith.constant 1 : index
    %c0_32 = arith.constant 0 : index
    %c0_33 = arith.constant 0 : index
    %46 = vector.load %arg2[%c1, %c0_32, %c0_33] : memref<2x6x8xf32, #tpu.memory_space<vmem>>, vector<1x6x8xf32>
    %47 = vector.shape_cast %46 : vector<1x6x8xf32> to vector<6x8xf32>
    %cst_34 = arith.constant dense<0.000000e+00> : vector<64x8xf32>
    %48 = tpu.matmul %3, %47, %cst_34 {dimension_numbers = #tpu.dot_dimension_numbers<[1], [0], [0], [1], [0, 0, 1, 1], [], []>} : vector<64x6xf32>, vector<6x8xf32>, vector<64x8xf32> -> vector<64x8xf32>
    %49 = vector.broadcast %4 : vector<64x1xf32> to vector<64x8xf32>
    %50 = arith.addf %48, %49 : vector<64x8xf32>
    %51 = vector.extract_strided_slice %50 {offsets = [0, 0], sizes = [32, 8], strides = [1, 1]} : vector<64x8xf32> to vector<32x8xf32>
    %52 = vector.extract_strided_slice %50 {offsets = [32, 0], sizes = [32, 8], strides = [1, 1]} : vector<64x8xf32> to vector<32x8xf32>
    %c1_35 = arith.constant 1 : index
    %c0_36 = arith.constant 0 : index
    %c0_37 = arith.constant 0 : index
    %53 = vector.load %arg13[%c1_35, %c0_36, %c0_37] : memref<2x16x32xf32, #tpu.memory_space<vmem>>, vector<1x16x32xf32>
    %54 = vector.shape_cast %53 : vector<1x16x32xf32> to vector<16x32xf32>
    %cst_38 = arith.constant dense<0.000000e+00> : vector<16x8xf32>
    %55 = tpu.matmul %54, %51, %cst_38 {dimension_numbers = #tpu.dot_dimension_numbers<[1], [0], [0], [1], [0, 0, 1, 1], [], []>} : vector<16x32xf32>, vector<32x8xf32>, vector<16x8xf32> -> vector<16x8xf32>
    %c1_39 = arith.constant 1 : index
    %c0_40 = arith.constant 0 : index
    %c0_41 = arith.constant 0 : index
    %56 = vector.load %arg14[%c1_39, %c0_40, %c0_41] : memref<2x16x1xf32, #tpu.memory_space<vmem>>, vector<1x16x1xf32>
    %57 = vector.shape_cast %56 : vector<1x16x1xf32> to vector<16x1xf32>
    %cst_42 = arith.constant dense<0xFF800000> : vector<16xf32>
    %58 = vector.multi_reduction <maximumf>, %55, %cst_42 [1] : vector<16x8xf32> to vector<16xf32>
    %59 = vector.shape_cast %58 : vector<16xf32> to vector<16x1xf32>
    %60 = arith.maximumf %57, %59 : vector<16x1xf32>
    %61 = arith.subf %57, %60 : vector<16x1xf32>
    %62 = math.exp %61 : vector<16x1xf32>
    %63 = vector.broadcast %60 : vector<16x1xf32> to vector<16x8xf32>
    %64 = arith.subf %55, %63 : vector<16x8xf32>
    %65 = math.exp %64 : vector<16x8xf32>
    %c1_43 = arith.constant 1 : index
    %c0_44 = arith.constant 0 : index
    %c0_45 = arith.constant 0 : index
    %66 = vector.load %arg15[%c1_43, %c0_44, %c0_45] : memref<2x16x1xf32, #tpu.memory_space<vmem>>, vector<1x16x1xf32>
    %67 = vector.shape_cast %66 : vector<1x16x1xf32> to vector<16x1xf32>
    %68 = arith.mulf %62, %67 : vector<16x1xf32>
    %cst_46 = arith.constant dense<0.000000e+00> : vector<16xf32>
    %69 = vector.multi_reduction <add>, %65, %cst_46 [1] : vector<16x8xf32> to vector<16xf32>
    %70 = vector.shape_cast %69 : vector<16xf32> to vector<16x1xf32>
    %71 = arith.addf %68, %70 : vector<16x1xf32>
    %c1_47 = arith.constant 1 : index
    %c0_48 = arith.constant 0 : index
    %c0_49 = arith.constant 0 : index
    %72 = vector.load %arg15[%c1_47, %c0_48, %c0_49] : memref<2x16x1xf32, #tpu.memory_space<vmem>>, vector<1x16x1xf32>
    %73 = vector.shape_cast %72 : vector<1x16x1xf32> to vector<16x1xf32>
    %74 = vector.shape_cast %71 : vector<16x1xf32> to vector<1x16x1xf32>
    tpu.vector_store %arg15[%c1_47, %c0_48, %c0_49], %74 {strides = array<i32>} : memref<2x16x1xf32, #tpu.memory_space<vmem>>, vector<1x16x1xf32>,
    %cst_50 = arith.constant dense<0.000000e+00> : vector<16x32xf32>
    %75 = tpu.matmul %65, %52, %cst_50 {dimension_numbers = #tpu.dot_dimension_numbers<[1], [1], [0], [0], [0, 0, 1, 0], [], []>} : vector<16x8xf32>, vector<32x8xf32>, vector<16x32xf32> -> vector<16x32xf32>
    %c1_51 = arith.constant 1 : index
    %c0_52 = arith.constant 0 : index
    %c0_53 = arith.constant 0 : index
    %76 = vector.load %arg16[%c1_51, %c0_52, %c0_53] : memref<2x16x32xf32, #tpu.memory_space<vmem>>, vector<1x16x32xf32>
    %77 = vector.shape_cast %76 : vector<1x16x32xf32> to vector<16x32xf32>
    %78 = vector.broadcast %62 : vector<16x1xf32> to vector<16x32xf32>
    %79 = arith.mulf %78, %77 : vector<16x32xf32>
    %80 = arith.addf %79, %75 : vector<16x32xf32>
    %c1_54 = arith.constant 1 : index
    %c0_55 = arith.constant 0 : index
    %c0_56 = arith.constant 0 : index
    %81 = vector.load %arg16[%c1_54, %c0_55, %c0_56] : memref<2x16x32xf32, #tpu.memory_space<vmem>>, vector<1x16x32xf32>
    %82 = vector.shape_cast %81 : vector<1x16x32xf32> to vector<16x32xf32>
    %83 = vector.shape_cast %80 : vector<16x32xf32> to vector<1x16x32xf32>
    tpu.vector_store %arg16[%c1_54, %c0_55, %c0_56], %83 {strides = array<i32>} : memref<2x16x32xf32, #tpu.memory_space<vmem>>, vector<1x16x32xf32>,
    %c1_57 = arith.constant 1 : index
    %c0_58 = arith.constant 0 : index
    %c0_59 = arith.constant 0 : index
    %84 = vector.load %arg14[%c1_57, %c0_58, %c0_59] : memref<2x16x1xf32, #tpu.memory_space<vmem>>, vector<1x16x1xf32>
    %85 = vector.shape_cast %84 : vector<1x16x1xf32> to vector<16x1xf32>
    %86 = vector.shape_cast %60 : vector<16x1xf32> to vector<1x16x1xf32>
    tpu.vector_store %arg14[%c1_57, %c0_58, %c0_59], %86 {strides = array<i32>} : memref<2x16x1xf32, #tpu.memory_space<vmem>>, vector<1x16x1xf32>,
    %c0_i32_60 = arith.constant 0 : i32
    %87 = arith.cmpi eq, %arg1, %c0_i32_60 : i32
    %88 = arith.extui %87 : i1 to i32
    %c0_i32_61 = arith.constant 0 : i32
    %89 = arith.cmpi ne, %88, %c0_i32_61 : i32
    scf.if %89 {
      %c0_62 = arith.constant 0 : index
      %c0_63 = arith.constant 0 : index
      %90 = vector.load %arg10[%c0_62, %c0_63] : memref<4x32xf32, #tpu.memory_space<vmem>>, vector<4x32xf32>
      %c0_64 = arith.constant 0 : index
      %c0_65 = arith.constant 0 : index
      %91 = vector.load %arg11[%c0_64, %c0_65] : memref<4x1xf32, #tpu.memory_space<vmem>>, vector<4x1xf32>
      %c0_66 = arith.constant 0 : index
      %c0_67 = arith.constant 0 : index
      %92 = vector.load %arg8[%c0_66, %c0_67] : memref<32x16xf32, #tpu.memory_space<vmem>>, vector<32x16xf32>
      %c0_68 = arith.constant 0 : index
      %c0_69 = arith.constant 0 : index
      %93 = vector.load %arg9[%c0_68, %c0_69] : memref<32x16xf32, #tpu.memory_space<vmem>>, vector<32x16xf32>
      %c0_70 = arith.constant 0 : index
      %c0_71 = arith.constant 0 : index
      %c0_72 = arith.constant 0 : index
      %94 = vector.load %arg16[%c0_70, %c0_71, %c0_72] : memref<2x16x32xf32, #tpu.memory_space<vmem>>, vector<1x16x32xf32>
      %95 = vector.shape_cast %94 : vector<1x16x32xf32> to vector<16x32xf32>
      %c0_73 = arith.constant 0 : index
      %c0_74 = arith.constant 0 : index
      %c0_75 = arith.constant 0 : index
      %96 = vector.load %arg15[%c0_73, %c0_74, %c0_75] : memref<2x16x1xf32, #tpu.memory_space<vmem>>, vector<1x16x1xf32>
      %97 = vector.shape_cast %96 : vector<1x16x1xf32> to vector<16x1xf32>
      %98 = tpu.reciprocal %97 {approx = true} : vector<16x1xf32> -> vector<16x1xf32>
      %99 = vector.broadcast %98 : vector<16x1xf32> to vector<16x32xf32>
      %100 = arith.mulf %95, %99 : vector<16x32xf32>
      %101 = tpu.transpose %100, [1, 0] : vector<16x32xf32> -> vector<32x16xf32>
      %102 = vector.shape_cast %101 : vector<32x16xf32> to vector<1x32x16xf32>
      %cst_76 = arith.constant dense<0.000000e+00> : vector<1xf32>
      %103 = vector.multi_reduction <add>, %102, %cst_76 [1, 2] : vector<1x32x16xf32> to vector<1xf32>
      %104 = vector.shape_cast %103 : vector<1xf32> to vector<1x1x1xf32>
      %105 = vector.extract %104[0, 0, 0] : f32 from vector<1x1x1xf32>
      %106 = vector.broadcast %105 : f32 to vector<1x1xf32>
      %cst_77 = arith.constant 0.001953125 : f32
      %107 = vector.broadcast %cst_77 : f32 to vector<1x1xf32>
      %108 = arith.mulf %106, %107 : vector<1x1xf32>
      %109 = vector.broadcast %108 : vector<1x1xf32> to vector<32x16xf32>
      %110 = arith.subf %101, %109 : vector<32x16xf32>
      %111 = arith.mulf %110, %110 : vector<32x16xf32>
      %112 = vector.shape_cast %111 : vector<32x16xf32> to vector<1x32x16xf32>
      %cst_78 = arith.constant dense<0.000000e+00> : vector<1xf32>
      %113 = vector.multi_reduction <add>, %112, %cst_78 [1, 2] : vector<1x32x16xf32> to vector<1xf32>
      %114 = vector.shape_cast %113 : vector<1xf32> to vector<1x1x1xf32>
      %115 = vector.extract %114[0, 0, 0] : f32 from vector<1x1x1xf32>
      %116 = vector.broadcast %115 : f32 to vector<1x1xf32>
      %cst_79 = arith.constant 0.001953125 : f32
      %117 = vector.broadcast %cst_79 : f32 to vector<1x1xf32>
      %118 = arith.mulf %116, %117 : vector<1x1xf32>
      %cst_80 = arith.constant 9.99999974E-6 : f32
      %119 = vector.broadcast %cst_80 : f32 to vector<1x1xf32>
      %120 = arith.addf %118, %119 : vector<1x1xf32>
      %121 = math.rsqrt %120 : vector<1x1xf32>
      %122 = vector.broadcast %121 : vector<1x1xf32> to vector<32x16xf32>
      %123 = arith.mulf %110, %122 : vector<32x16xf32>
      %124 = arith.mulf %123, %92 : vector<32x16xf32>
      %125 = arith.addf %124, %93 : vector<32x16xf32>
      %cst_81 = arith.constant 0.000000e+00 : f32
      %126 = vector.broadcast %cst_81 : f32 to vector<32x16xf32>
      %127 = arith.maximumf %125, %126 : vector<32x16xf32>
      %cst_82 = arith.constant dense<0.000000e+00> : vector<4x16xf32>
      %128 = tpu.matmul %90, %127, %cst_82 {dimension_numbers = #tpu.dot_dimension_numbers<[1], [0], [0], [1], [0, 0, 1, 1], [], []>} : vector<4x32xf32>, vector<32x16xf32>, vector<4x16xf32> -> vector<4x16xf32>
      %129 = vector.broadcast %91 : vector<4x1xf32> to vector<4x16xf32>
      %130 = arith.addf %128, %129 : vector<4x16xf32>
      %c0_83 = arith.constant 0 : index
      %c0_84 = arith.constant 0 : index
      %c0_85 = arith.constant 0 : index
      %131 = vector.load %arg3[%c0_83, %c0_84, %c0_85] : memref<2x4x16xf32, #tpu.memory_space<vmem>>, vector<1x4x16xf32>
      %132 = vector.shape_cast %131 : vector<1x4x16xf32> to vector<4x16xf32>
      %133 = arith.addf %130, %132 : vector<4x16xf32>
      %c0_86 = arith.constant 0 : index
      %c0_87 = arith.constant 0 : index
      %c0_88 = arith.constant 0 : index
      %134 = vector.load %arg12[%c0_86, %c0_87, %c0_88] : memref<2x4x16xf32, #tpu.memory_space<vmem>>, vector<1x4x16xf32>
      %135 = vector.shape_cast %134 : vector<1x4x16xf32> to vector<4x16xf32>
      %136 = vector.shape_cast %133 : vector<4x16xf32> to vector<1x4x16xf32>
      tpu.vector_store %arg12[%c0_86, %c0_87, %c0_88], %136 {strides = array<i32>} : memref<2x4x16xf32, #tpu.memory_space<vmem>>, vector<1x4x16xf32>,
      %c1_89 = arith.constant 1 : index
      %c0_90 = arith.constant 0 : index
      %c0_91 = arith.constant 0 : index
      %137 = vector.load %arg16[%c1_89, %c0_90, %c0_91] : memref<2x16x32xf32, #tpu.memory_space<vmem>>, vector<1x16x32xf32>
      %138 = vector.shape_cast %137 : vector<1x16x32xf32> to vector<16x32xf32>
      %c1_92 = arith.constant 1 : index
      %c0_93 = arith.constant 0 : index
      %c0_94 = arith.constant 0 : index
      %139 = vector.load %arg15[%c1_92, %c0_93, %c0_94] : memref<2x16x1xf32, #tpu.memory_space<vmem>>, vector<1x16x1xf32>
      %140 = vector.shape_cast %139 : vector<1x16x1xf32> to vector<16x1xf32>
      %141 = tpu.reciprocal %140 {approx = true} : vector<16x1xf32> -> vector<16x1xf32>
      %142 = vector.broadcast %141 : vector<16x1xf32> to vector<16x32xf32>
      %143 = arith.mulf %138, %142 : vector<16x32xf32>
      %144 = tpu.transpose %143, [1, 0] : vector<16x32xf32> -> vector<32x16xf32>
      %145 = vector.shape_cast %144 : vector<32x16xf32> to vector<1x32x16xf32>
      %cst_95 = arith.constant dense<0.000000e+00> : vector<1xf32>
      %146 = vector.multi_reduction <add>, %145, %cst_95 [1, 2] : vector<1x32x16xf32> to vector<1xf32>
      %147 = vector.shape_cast %146 : vector<1xf32> to vector<1x1x1xf32>
      %148 = vector.extract %147[0, 0, 0] : f32 from vector<1x1x1xf32>
      %149 = vector.broadcast %148 : f32 to vector<1x1xf32>
      %cst_96 = arith.constant 0.001953125 : f32
      %150 = vector.broadcast %cst_96 : f32 to vector<1x1xf32>
      %151 = arith.mulf %149, %150 : vector<1x1xf32>
      %152 = vector.broadcast %151 : vector<1x1xf32> to vector<32x16xf32>
      %153 = arith.subf %144, %152 : vector<32x16xf32>
      %154 = arith.mulf %153, %153 : vector<32x16xf32>
      %155 = vector.shape_cast %154 : vector<32x16xf32> to vector<1x32x16xf32>
      %cst_97 = arith.constant dense<0.000000e+00> : vector<1xf32>
      %156 = vector.multi_reduction <add>, %155, %cst_97 [1, 2] : vector<1x32x16xf32> to vector<1xf32>
      %157 = vector.shape_cast %156 : vector<1xf32> to vector<1x1x1xf32>
      %158 = vector.extract %157[0, 0, 0] : f32 from vector<1x1x1xf32>
      %159 = vector.broadcast %158 : f32 to vector<1x1xf32>
      %cst_98 = arith.constant 0.001953125 : f32
      %160 = vector.broadcast %cst_98 : f32 to vector<1x1xf32>
      %161 = arith.mulf %159, %160 : vector<1x1xf32>
      %cst_99 = arith.constant 9.99999974E-6 : f32
      %162 = vector.broadcast %cst_99 : f32 to vector<1x1xf32>
      %163 = arith.addf %161, %162 : vector<1x1xf32>
      %164 = math.rsqrt %163 : vector<1x1xf32>
      %165 = vector.broadcast %164 : vector<1x1xf32> to vector<32x16xf32>
      %166 = arith.mulf %153, %165 : vector<32x16xf32>
      %167 = arith.mulf %166, %92 : vector<32x16xf32>
      %168 = arith.addf %167, %93 : vector<32x16xf32>
      %cst_100 = arith.constant 0.000000e+00 : f32
      %169 = vector.broadcast %cst_100 : f32 to vector<32x16xf32>
      %170 = arith.maximumf %168, %169 : vector<32x16xf32>
      %cst_101 = arith.constant dense<0.000000e+00> : vector<4x16xf32>
      %171 = tpu.matmul %90, %170, %cst_101 {dimension_numbers = #tpu.dot_dimension_numbers<[1], [0], [0], [1], [0, 0, 1, 1], [], []>} : vector<4x32xf32>, vector<32x16xf32>, vector<4x16xf32> -> vector<4x16xf32>
      %172 = vector.broadcast %91 : vector<4x1xf32> to vector<4x16xf32>
      %173 = arith.addf %171, %172 : vector<4x16xf32>
      %c1_102 = arith.constant 1 : index
      %c0_103 = arith.constant 0 : index
      %c0_104 = arith.constant 0 : index
      %174 = vector.load %arg3[%c1_102, %c0_103, %c0_104] : memref<2x4x16xf32, #tpu.memory_space<vmem>>, vector<1x4x16xf32>
      %175 = vector.shape_cast %174 : vector<1x4x16xf32> to vector<4x16xf32>
      %176 = arith.addf %173, %175 : vector<4x16xf32>
      %c1_105 = arith.constant 1 : index
      %c0_106 = arith.constant 0 : index
      %c0_107 = arith.constant 0 : index
      %177 = vector.load %arg12[%c1_105, %c0_106, %c0_107] : memref<2x4x16xf32, #tpu.memory_space<vmem>>, vector<1x4x16xf32>
      %178 = vector.shape_cast %177 : vector<1x4x16xf32> to vector<4x16xf32>
      %179 = vector.shape_cast %176 : vector<4x16xf32> to vector<1x4x16xf32>
      tpu.vector_store %arg12[%c1_105, %c0_106, %c0_107], %179 {strides = array<i32>} : memref<2x4x16xf32, #tpu.memory_space<vmem>>, vector<1x4x16xf32>,
    } else {
    }
    return
  }
  func.func @transform_0(%arg0: i32, %arg1: i32) -> (i32, i32, i32) {
    %c0_i32 = arith.constant 0 : i32
    %c0_i32_0 = arith.constant 0 : i32
    return %arg0, %c0_i32, %arg1 : i32, i32, i32
  }
  func.func @transform_1(%arg0: i32, %arg1: i32) -> (i32, i32, i32) {
    %c0_i32 = arith.constant 0 : i32
    %c0_i32_0 = arith.constant 0 : i32
    %c0_i32_1 = arith.constant 0 : i32
    return %arg0, %c0_i32, %c0_i32_0 : i32, i32, i32
  }
  func.func @transform_2(%arg0: i32, %arg1: i32) -> (i32, i32) {
    %c0_i32 = arith.constant 0 : i32
    %c0_i32_0 = arith.constant 0 : i32
    %c0_i32_1 = arith.constant 0 : i32
    return %c0_i32, %c0_i32_0 : i32, i32
  }
  func.func @transform_3(%arg0: i32, %arg1: i32) -> (i32, i32) {
    %c0_i32 = arith.constant 0 : i32
    %c0_i32_0 = arith.constant 0 : i32
    %c0_i32_1 = arith.constant 0 : i32
    return %c0_i32, %c0_i32_0 : i32, i32
  }
  func.func @transform_4(%arg0: i32, %arg1: i32) -> (i32, i32) {
    %c0_i32 = arith.constant 0 : i32
    %c0_i32_0 = arith.constant 0 : i32
    %c0_i32_1 = arith.constant 0 : i32
    return %c0_i32, %c0_i32_0 : i32, i32
  }
  func.func @transform_5(%arg0: i32, %arg1: i32) -> (i32, i32) {
    %c0_i32 = arith.constant 0 : i32
    %c0_i32_0 = arith.constant 0 : i32
    %c0_i32_1 = arith.constant 0 : i32
    return %c0_i32, %c0_i32_0 : i32, i32
  }
  func.func @transform_6(%arg0: i32, %arg1: i32) -> (i32, i32) {
    %c0_i32 = arith.constant 0 : i32
    %c0_i32_0 = arith.constant 0 : i32
    %c0_i32_1 = arith.constant 0 : i32
    return %c0_i32, %c0_i32_0 : i32, i32
  }
  func.func @transform_7(%arg0: i32, %arg1: i32) -> (i32, i32) {
    %c0_i32 = arith.constant 0 : i32
    %c0_i32_0 = arith.constant 0 : i32
    %c0_i32_1 = arith.constant 0 : i32
    return %c0_i32, %c0_i32_0 : i32, i32
  }
  func.func @transform_8(%arg0: i32, %arg1: i32) -> (i32, i32) {
    %c0_i32 = arith.constant 0 : i32
    %c0_i32_0 = arith.constant 0 : i32
    %c0_i32_1 = arith.constant 0 : i32
    return %c0_i32, %c0_i32_0 : i32, i32
  }
  func.func @transform_9(%arg0: i32, %arg1: i32) -> (i32, i32) {
    %c0_i32 = arith.constant 0 : i32
    %c0_i32_0 = arith.constant 0 : i32
    %c0_i32_1 = arith.constant 0 : i32
    return %c0_i32, %c0_i32_0 : i32, i32
  }
  func.func @transform_10(%arg0: i32, %arg1: i32) -> (i32, i32, i32) {
    %c0_i32 = arith.constant 0 : i32
    %c0_i32_0 = arith.constant 0 : i32
    %c0_i32_1 = arith.constant 0 : i32
    return %arg0, %c0_i32, %c0_i32_0 : i32, i32, i32
  }
}

</mosaic_0001>

<bundles_post_ra>
// kernel: tpu_custom_call.1
= control target key start
LH: loop header
LB: loop body
LE: loop exit
PB: predicated region body
PF: predicated region fallthrough
CT: control target
= control target key end

     0   :  { %vm82_vm0 = vcmask 1043456   ;;  %vm69_vm1 = vcmask 31744   ;;  %vm426_vm2 = vcmask 1045504   ;;  %vm401_vm3 = vcmask 48128   ;;  %s2268_s0 = inlined_call_operand.vmem [shape: f32[2,6,8], index: 0, kind: input, shape index: {}]   ;;  %s2269_s1 = inlined_call_operand.vmem [shape: f32[2,4,16], index: 1, kind: input, shape index: {}]   ;;  %s2270_s2 = inlined_call_operand.vmem [shape: f32[32,4], index: 2, kind: input, shape index: {}]   ;;  %s2271_s3 = inlined_call_operand.vmem [shape: f32[32,1], index: 3, kind: input, shape index: {}]   ;;  %s2272_s4 = inlined_call_operand.vmem [shape: f32[64,6], index: 4, kind: input, shape index: {}]   ;;  %s2273_s5 = inlined_call_operand.vmem [shape: f32[64,1], index: 5, kind: input, shape index: {}]   ;;  %s2274_s6 = inlined_call_operand.vmem [shape: f32[32,16], index: 6, kind: input, shape index: {}]   ;;  %s2275_s7 = inlined_call_operand.vmem [shape: f32[32,16], index: 7, kind: input, shape index: {}]   ;;  %s2276_s8 = inlined_call_operand.vmem [shape: f32[4,32], index: 8, kind: input, shape index: {}]   ;;  %s2277_s9 = inlined_call_operand.vmem [shape: f32[4,1], index: 9, kind: input, shape index: {}]   ;;  %s2278_s10 = inlined_call_operand.hbm [shape: f32[2,4,16], index: 10, kind: output, shape index: {}]  }
   0x1   :  { %v48_v0 = vld [vmem:[%s2269_s1] sm:$0xf]  ;;  %v1552_v1 = vld [vmem:[%s2269_s1 + $0x4] sm:$0xf]  ;;  %v41_v3 = vld [vmem:[%s2270_s2 + $0x8] sm:$0xff] }
   0x2   :  { %v40_v2 = vld [vmem:[%s2270_s2] sm:$0xff]  ;;  %1658 = vmatprep.subr.msk.mxu0 %vm82_vm0, %v48_v0  ;;  %1666 = vmatprep.subr.msk.mxu1 %vm82_vm0, %v1552_v1  ;;  %v42_v4 = vld [vmem:[%s2270_s2 + $0x10] sm:$0xff]  ;;  %v43_v6 = vld [vmem:[%s2270_s2 + $0x18] sm:$0xff] }
   0x3   :  { %1659 = vmatpush3.msk.msra.mxu0 %vm82_vm0, %v48_v0  ;;  %1660 = vmatprep.mubr.msk.f32.mxu0 %vm69_vm1, %v40_v2  ;;  %v360_v5 = vld [vmem:[%s2268_s0] sm:$0x3f] }
   0x4   :  { %1667 = vmatpush3.msk.msra.mxu1 %vm82_vm0, %v1552_v1  ;;  %1668 = vmatprep.mubr.msk.f32.mxu1 %vm69_vm1, %v40_v2  ;;  %v1929_v7 = vld [vmem:[%s2272_s4] sm:$0xff] }
   0x5   :  { %1661 = vmatmul.mubr.msk.f32.vlgmr.msra.gmra.mxu0 %vm69_vm1, %v41_v3  ;;  %1669 = vmatmul.mubr.msk.f32.vlgmr.msra.gmra.mxu1 %vm69_vm1, %v41_v3  ;;  %v44_v8 = vld [vmem:[%s2271_s3] sm:$0xff] }
   0x6   :  { %1663 = vmatprep.mubr.msk.f32.mxu0 %vm69_vm1, %v42_v4  ;;  %1674 = vmatprep.subr.msk.mxu0 %vm426_vm2, %v360_v5 }
   0x7   :  { %1671 = vmatprep.mubr.msk.f32.mxu1 %vm69_vm1, %v42_v4  ;;  %1675 = vmatpush3.msk.msra.mxu0 %vm426_vm2, %v360_v5 }
   0x8   :  { %15 = vsyncpa [#allocation7], 0  ;;  %v1835_v9 = vmov 0   ;;  %v46_v10 = vld [vmem:[%s2271_s3 + $0x10] sm:$0xff]  ;;  %v1944_v11 = vld [vmem:[%s2272_s4 + $0x8] sm:$0xff]  ;;  %vm203_vm4 = vcmask 261120  }
   0x9   :  { %1783 = vset.pattern.permute.xlu0 %v1835_v9  ;;  %1784 = vset.pattern.permute.xlu1 %v1835_v9  ;;  %v1949_v12 = vld [vmem:[%s2272_s4 + $0x10] sm:$0xff]  ;;  %v45_v13 = vld [vmem:[%s2271_s3 + $0x8] sm:$0xff]  ;;  %v47_v14 = vld [vmem:[%s2271_s3 + $0x18] sm:$0xff]  ;;  %vm331_vm5 = vcmask 7168   ;;  %v1836_v0 = vmov -inf   ;;  %vm621_vm6 = vcmask 64512  }
   0xa   :  { %1664 = vmatmul.mubr.msk.f32.gmra.mxu0 %vm69_vm1, %v43_v6  ;;  %1672 = vmatmul.mubr.msk.f32.gmra.mxu1 %vm69_vm1, %v43_v6  ;;  %v1964_v15 = vld [vmem:[%s2272_s4 + $0x18] sm:$0xff]  ;;  %v354_v17 = vld [vmem:[%s2273_s5 + $0x10] sm:$0xff]  ;;  %v353_v18 = vld [vmem:[%s2273_s5 + $0x8] sm:$0xff]  ;;  %333 = vst.msk [vmem:[#allocation3 + $0x8] sm:$0xff] %vm331_vm5, %v1836_v0  ;;  %vm1199_vm7 = vcmask 130048   ;;  %vm1838_vm8 = vmmov 0  }
   0xb   :  { %1676 = vmatprep.mubr.msk.f32.mxu0 %vm401_vm3, %v1929_v7  ;;  %51 = vperm.xlu0 %1783, %v44_v8   ;;  %v355_v16 = vld [vmem:[%s2273_s5 + $0x18] sm:$0xff]  ;;  %v352_v19 = vld [vmem:[%s2273_s5] sm:$0xff]  ;;  %v1575_v52 = vld [vmem:[%s2268_s0 + $0x8] sm:$0x3f]  ;;  %332 = vst.msk [vmem:[#allocation3] sm:$0xff] %vm331_vm5, %v1836_v0  ;;  %vm1342_vm9 = vcmask 125952  }
   0xc   :  { %61 = vperm.xlu1 %1784, %v46_v10   ;;  %v348_v53 = vld [vmem:[%s2272_s4 + $0x20] sm:$0xff]  ;;  %v349_v54 = vld [vmem:[%s2272_s4 + $0x28] sm:$0xff]  ;;  %v350_v55 = vld [vmem:[%s2272_s4 + $0x30] sm:$0xff]  ;;  %334 = vst.msk [vmem:[#allocation3 + $0x10] sm:$0xff] %vm331_vm5, %v1836_v0  ;;  %s1839_s23 = smov [#allocation6]  }
   0xd   :  { %v351_v56 = vld [vmem:[%s2272_s4 + $0x38] sm:$0xff]  ;;  %335 = vst.msk [vmem:[#allocation3 + $0x18] sm:$0xff] %vm331_vm5, %v1836_v0 }
   0xe   :  { %1677 = vmatmul.mubr.msk.f32.vlgmr.msra.gmra.mxu0 %vm401_vm3, %v1944_v11 }
   0xf   :  { %1679 = vmatprep.mubr.msk.f32.mxu0 %vm401_vm3, %v1949_v12  ;;  %56 = vperm.xlu0 %1783, %v45_v13   ;;  %v359_v13 = vld [vmem:[%s2273_s5 + $0x38] sm:$0xff] }
  0x10   :  { %66 = vperm.xlu1 %1784, %v47_v14  }
  0x12   :  { %1680 = vmatmul.mubr.msk.f32.gmra.mxu0 %vm401_vm3, %v1964_v15 }
  0x13   :  { %378 = vperm.xlu0 %1783, %v355_v16   ;;  %1682 = vmatprep.mubr.msk.f32.mxu0 %vm401_vm3, %v348_v53  ;;  %v356_v16 = vld [vmem:[%s2273_s5 + $0x20] sm:$0xff] }
  0x14   :  { %373 = vperm.xlu1 %1784, %v354_v17   ;;  %v1837_v17 = vmov 0.0  }
  0x15   :  { %337 = vst.msk [vmem:[#allocation4 + $0x8] sm:$0xff] %vm331_vm5, %v1837_v17  ;;  %336 = vst.msk [vmem:[#allocation4] sm:$0xff] %vm331_vm5, %v1837_v17 }
  0x16   :  { %1683 = vmatmul.mubr.msk.f32.gmra.mxu0 %vm401_vm3, %v349_v54  ;;  %338 = vst.msk [vmem:[#allocation4 + $0x10] sm:$0xff] %vm331_vm5, %v1837_v17  ;;  %339 = vst.msk [vmem:[#allocation4 + $0x18] sm:$0xff] %vm331_vm5, %v1837_v17 }
  0x17   :  { %368 = vperm.xlu0 %1783, %v353_v18   ;;  %1685 = vmatprep.mubr.msk.f32.mxu0 %vm401_vm3, %v350_v55  ;;  %340 = vst.msk [vmem:[#allocation5] sm:$0xff] %vm203_vm4, %v1837_v17  ;;  %341 = vst.msk [vmem:[#allocation5 + $0x8] sm:$0xff] %vm203_vm4, %v1837_v17 }
  0x18   :  { %363 = vperm.xlu1 %1784, %v352_v19   ;;  %342 = vst.msk [vmem:[#allocation5 + $0x10] sm:$0xff] %vm203_vm4, %v1837_v17  ;;  %343 = vst.msk [vmem:[#allocation5 + $0x18] sm:$0xff] %vm203_vm4, %v1837_v17 }
  0x1a   :  { %1686 = vmatmul.mubr.msk.f32.gmra.mxu0 %vm401_vm3, %v351_v56 }
  0x86   :  { %v52_v20 = vpop.permute.xlu0 %51 }
  0x87   :  { %v62_v21 = vpop.permute.xlu1 %61 }
  0x8a   :  { %v57_v26 = vpop.permute.xlu0 %56 }
  0x8b   :  { %v67_v27 = vpop.permute.xlu1 %66 }
  0x8e   :  { %v1980_v37 = vpop.permute.xlu0 %378 }
  0x8f   :  { %v1982_v39 = vpop.permute.xlu1 %373 }
  0x92   :  { %v1986_v47 = vpop.permute.xlu0 %368 }
  0x93   :  { %v1988_v49 = vpop.permute.xlu1 %363 }
  0xc5   :  { %v1662_v22 = vpop.f32.mrf.mxu0  ;;  %v1670_v23 = vpop.f32.mrf.mxu1 }
  0xc6   :  { %v158_v34 = vadd.f32 %v1662_v22, %v57_v26  ;;  %v283_v35 = vadd.f32 %v1670_v23, %v57_v26 }
  0xc7   :  { %v152_v24 = vpop.f32.mrf.mxu0  ;;  %v277_v25 = vpop.f32.mrf.mxu1 }
  0xc8   :  { %v153_v28 = vadd.f32 %v152_v24, %v52_v20  ;;  %v278_v29 = vadd.f32 %v277_v25, %v52_v20  ;;  %v2075_v20 = vld [vmem:[#allocation3 + $0x8] sm:$0xff]  ;;  %v2079_v24 = vld [vmem:[#allocation3] sm:$0xff] }
  0xca   :  { %v1665_v30 = vpop.f32.mrf.mxu0  ;;  %v1673_v31 = vpop.f32.mrf.mxu1  ;;  %296 = vxpose.xlu1.b32.start [1/4] (short) (narrow) %v278_v29, 16  ;;  %171 = vxpose.xlu0.b32.start [1/4] (short) (narrow) %v153_v28, 16 }
  0xcb   :  { %v293_v45 = vadd.f32 %v1673_v31, %v67_v27  ;;  %v168_v48 = vadd.f32 %v1665_v30, %v67_v27 }
  0xcc   :  { %v162_v32 = vpop.f32.mrf.mxu0  ;;  %v287_v33 = vpop.f32.mrf.mxu1 }
  0xcd   :  { %v288_v38 = vadd.f32 %v287_v33, %v62_v21  ;;  %v163_v41 = vadd.f32 %v162_v32, %v62_v21 }
  0xce   :  { %v1678_v36 = vpop.f32.mrf.mxu0  ;;  %297 = vxpose.xlu1.b32.cont [2/4] (short) (narrow) %v283_v35, 16  ;;  %172 = vxpose.xlu0.b32.cont [2/4] (short) (narrow) %v158_v34, 16 }
  0xcf   :  { %v502_v50 = vadd.f32 %v1678_v36, %v1986_v47 }
  0xd0   :  { %v496_v40 = vpop.f32.mrf.mxu0 }
  0xd1   :  { %v497_v51 = vadd.f32 %v496_v40, %v1988_v49 }
  0xd2   :  { %v1681_v42 = vpop.f32.mrf.mxu0  ;;  %298 = vxpose.xlu1.b32.cont [3/4] (short) (narrow) %v288_v38, 16  ;;  %173 = vxpose.xlu0.b32.cont [3/4] (short) (narrow) %v163_v41, 16 }
  0xd3   :  { %v512_v43 = vadd.f32 %v1681_v42, %v1980_v37 }
  0xd4   :  { %v506_v44 = vpop.f32.mrf.mxu0 }
  0xd5   :  { %v507_v46 = vadd.f32 %v506_v44, %v1982_v39  ;;  %1688 = vmatprep.subr.mxu1 %v512_v43 }
  0xd6   :  { %1689 = vmatpush3.msra.mxu1 %v512_v43  ;;  %299 = vxpose.xlu1.b32.end [4/4] (short) (narrow) %v293_v45, 16  ;;  %v1684_v18 = vpop.f32.mrf.mxu0 }
  0xd7   :  { %1690 = vmatprep.subr.mxu1 %v507_v46  ;;  %174 = vxpose.xlu0.b32.end [4/4] (short) (narrow) %v168_v48, 16 }
  0xd8   :  { %1691 = vmatpush3.msra.mxu1 %v507_v46  ;;  %v516_v21 = vpop.f32.mrf.mxu0 }
  0xd9   :  { %1692 = vmatprep.subr.mxu1 %v502_v50 }
  0xda   :  { %1693 = vmatpush3.msra.mxu1 %v502_v50  ;;  %v1687_v27 = vpop.f32.mrf.mxu0 }
  0xdb   :  { %1694 = vmatprep.subr.mxu1 %v497_v51 }
  0xdc   :  { %1695 = vmatpush3.msra.mxu1 %v497_v51  ;;  %v526_v34 = vpop.f32.mrf.mxu0 }
  0xdd   :  { %1710 = vmatprep.subr.msk.mxu1 %vm426_vm2, %v1575_v52 }
 0x146   :  { %v312_v61 = vpop.trf.xlu1 }
 0x147   :  { %v187_v57 = vpop.trf.xlu0  ;;  %329 = vst.msk [vmem:[#allocation2 + $0x10] sm:$0xff] %vm203_vm4, %v312_v61 }
 0x148   :  { %204 = vst.msk [vmem:[#allocation2] sm:$0xff] %vm203_vm4, %v187_v57 }
 0x14a   :  { %v313_v62 = vpop.trf.xlu1 }
 0x14b   :  { %v188_v58 = vpop.trf.xlu0  ;;  %330 = vst.msk [vmem:[#allocation2 + $0x18] sm:$0xff] %vm203_vm4, %v313_v62 }
 0x14c   :  { %205 = vst.msk [vmem:[#allocation2 + $0x8] sm:$0xff] %vm203_vm4, %v188_v58 }
 0x14e   :  { %v891_v63 = vld [vmem:[#allocation2 + $0x10] sm:$0xff] }
 0x14f   :  { %v535_v59 = vld [vmem:[#allocation2] sm:$0xff] }
 0x150   :  { %1696 = vmatprep.mubr.msk.f32.mxu1 %vm203_vm4, %v535_v59 }
 0x152   :  { %v892_v14 = vld [vmem:[#allocation2 + $0x18] sm:$0xff] }
 0x153   :  { %v536_v60 = vld [vmem:[#allocation2 + $0x8] sm:$0xff] }
 0x154   :  { %1697 = vmatmul.mubr.msk.f32.vlgmr.msra.gmra.mxu1 %vm203_vm4, %v536_v60 }
 0x155   :  { %1711 = vmatpush3.msk.msra.mxu1 %vm426_vm2, %v1575_v52  ;;  %1712 = vmatprep.mubr.msk.f32.mxu1 %vm401_vm3, %v1929_v7 }
 0x158   :  { %1713 = vmatmul.mubr.msk.f32.vlgmr.msra.gmra.mxu1 %vm401_vm3, %v1944_v11 }
 0x159   :  { %1715 = vmatprep.mubr.msk.f32.mxu1 %vm401_vm3, %v1949_v12 }
 0x15c   :  { %1716 = vmatmul.mubr.msk.f32.gmra.mxu1 %vm401_vm3, %v1964_v15  ;;  %v358_v15 = vld [vmem:[%s2273_s5 + $0x30] sm:$0xff] }
 0x15d   :  { %1718 = vmatprep.mubr.msk.f32.mxu1 %vm401_vm3, %v348_v53 }
 0x160   :  { %1719 = vmatmul.mubr.msk.f32.gmra.mxu1 %vm401_vm3, %v349_v54 }
 0x161   :  { %1721 = vmatprep.mubr.msk.f32.mxu1 %vm401_vm3, %v350_v55 }
 0x164   :  { %1722 = vmatmul.mubr.msk.f32.gmra.mxu1 %vm401_vm3, %v351_v56 }
 0x165   :  { %1732 = vmatprep.mubr.msk.f32.mxu1 %vm203_vm4, %v891_v63  ;;  %v2126_v63 = vld [vmem:[#allocation3 + $0x18] sm:$0xff] }
 0x214   :  { %v2036_v1 = vpop.f32.mrf.mxu1 }
 0x215   :  { %v625_v2 = vsel %vm621_vm6, %v2036_v1, -inf }
 0x216   :  { %626 = vmax.xlane.f32.xlu1 %v625_v2  ;;  %v2040_v3 = vpop.f32.mrf.mxu1 }
 0x217   :  { %v622_v4 = vsel %vm621_vm6, %v2040_v3, -inf }
 0x218   :  { %v1714_v5 = vpop.f32.mrf.mxu1  ;;  %623 = vmax.xlane.f32.xlu0 %v622_v4 }
 0x219   :  { %v857_v11 = vadd.f32 %v1714_v5, %v1986_v47 }
 0x21a   :  { %v851_v6 = vpop.f32.mrf.mxu1 }
 0x21b   :  { %v852_v12 = vadd.f32 %v851_v6, %v1988_v49 }
 0x21c   :  { %v1717_v7 = vpop.f32.mrf.mxu1 }
 0x21d   :  { %v867_v8 = vadd.f32 %v1717_v7, %v1980_v37 }
 0x21e   :  { %v861_v9 = vpop.f32.mrf.mxu1 }
 0x21f   :  { %v862_v10 = vadd.f32 %v861_v9, %v1982_v39  ;;  %1724 = vmatprep.subr.mxu1 %v867_v8  ;;  %v357_v39 = vld [vmem:[%s2273_s5 + $0x28] sm:$0xff] }
 0x220   :  { %1725 = vmatpush3.msra.mxu1 %v867_v8  ;;  %v1720_v19 = vpop.f32.mrf.mxu1  ;;  %v653_v9 = vld [vmem:[#allocation4 + $0x8] sm:$0xff] }
 0x221   :  { %1726 = vmatprep.subr.mxu1 %v862_v10 }
 0x222   :  { %1727 = vmatpush3.msra.mxu1 %v862_v10  ;;  %v2077_v23 = vpop.f32.mrf.mxu1 }
 0x223   :  { %1728 = vmatprep.subr.mxu1 %v857_v11 }
 0x224   :  { %1729 = vmatpush3.msra.mxu1 %v857_v11  ;;  %v1723_v31 = vpop.f32.mrf.mxu1 }
 0x225   :  { %1730 = vmatprep.subr.mxu1 %v852_v12 }
 0x226   :  { %1731 = vmatpush3.msra.mxu1 %v852_v12  ;;  %v881_v35 = vpop.f32.mrf.mxu1  ;;  %v652_v12 = vld [vmem:[#allocation4] sm:$0xff] }
 0x227   :  { %398 = vperm.xlu1 %1784, %v359_v13   ;;  %1733 = vmatmul.mubr.msk.f32.vlgmr.msra.gmra.mxu1 %vm203_vm4, %v892_v14 }
 0x228   :  { %1746 = vmatprep.subr.mxu1 %v1837_v17  ;;  %1754 = vmatprep.mubr.msk.f32.mxu1 %vm1838_vm8, %v1837_v17 }
 0x22b   :  { %393 = vperm.xlu1 %1784, %v358_v15  }
 0x22f   :  { %383 = vperm.xlu1 %1784, %v356_v16  }
 0x29f   :  { %v627_v22 = vpop.xlane.xlu1 %626 }
 0x2a0   :  { %v2082_v25 = vmax.f32 %v2075_v20, %v627_v22 }
 0x2a1   :  { %v624_v26 = vpop.xlane.xlu0 %623 }
 0x2a2   :  { %v631_v28 = vsub.f32 %v2075_v20, %v2082_v25  ;;  %779 = vst.msk [vmem:[#allocation3 + $0x8] sm:$0xff] %vm331_vm5, %v2082_v25  ;;  %v628_v29 = vmax.f32 %v2079_v24, %v624_v26 }
 0x2a3   :  { %v399_v30 = vpop.permute.xlu1 %398 }
 0x2a4   :  { %v630_v32 = vsub.f32 %v2079_v24, %v628_v29  ;;  %778 = vst.msk [vmem:[#allocation3] sm:$0xff] %vm331_vm5, %v628_v29  ;;  %v532_v33 = vadd.f32 %v1687_v27, %v399_v30  ;;  %638 = vperm.xlu0 %1783, %v628_v29   ;;  %v887_v54 = vadd.f32 %v1723_v31, %v399_v30  ;;  %v634_v62 = vmul.f32 1.442695, %v631_v28  ;;  %v760_v27 = vld [vmem:[#allocation5] sm:$0xff] }
 0x2a6   :  { %1699 = vmatprep.subr.msk.mxu0 %vm621_vm6, %v532_v33  ;;  %v632_v61 = vmul.f32 1.442695, %v630_v32 }
 0x2a7   :  { %1700 = vmatpush3.xpose.msk.msra.mxu0 %vm621_vm6, %v532_v33  ;;  %v394_v36 = vpop.permute.xlu1 %393  ;;  %v761_v33 = vld [vmem:[#allocation5 + $0x8] sm:$0xff] }
 0x2a8   :  { %v527_v37 = vadd.f32 %v526_v34, %v394_v36  ;;  %v882_v38 = vadd.f32 %v881_v35, %v394_v36  ;;  %643 = vperm.xlu0 %1783, %v2082_v25  }
 0x2aa   :  { %1701 = vmatprep.subr.msk.mxu0 %vm621_vm6, %v527_v37 }
 0x2ab   :  { %1702 = vmatpush3.xpose.msk.msra.mxu0 %vm621_vm6, %v527_v37  ;;  %v384_v50 = vpop.permute.xlu1 %383 }
 0x2ac   :  { %388 = vperm.xlu0 %1783, %v357_v39   ;;  %v517_v53 = vadd.f32 %v516_v21, %v384_v50  ;;  %v872_v60 = vadd.f32 %v2077_v23, %v384_v50 }
 0x2e7   :  { %v2099_v40 = vpop.f32.mrf.mxu1 }
 0x2e8   :  { %v980_v41 = vsel %vm621_vm6, %v2099_v40, -inf }
 0x2e9   :  { %981 = vmax.xlane.f32.xlu1 %v980_v41  ;;  %v2103_v42 = vpop.f32.mrf.mxu1 }
 0x2ea   :  { %v977_v43 = vsel %vm621_vm6, %v2103_v42, -inf }
 0x2eb   :  { %978 = vmax.xlane.f32.xlu0 %v977_v43 }
 0x31f   :  { %v639_v44 = vpop.permute.xlu0 %638 }
 0x320   :  { %v646_v45 = vsub.f32 %v2040_v3, %v639_v44 }
 0x322   :  { %v648_v46 = vmul.f32 1.442695, %v646_v45 }
 0x323   :  { %v644_v47 = vpop.permute.xlu0 %643 }
 0x324   :  { %1785 = vpow2.f32 %v648_v46  ;;  %v647_v48 = vsub.f32 %v2036_v1, %v644_v47  ;;  %v975_v1 = vld [vmem:[#allocation3 + $0x10] sm:$0xff] }
 0x326   :  { %v650_v49 = vmul.f32 1.442695, %v647_v48 }
 0x327   :  { %v389_v51 = vpop.permute.xlu0 %388 }
 0x328   :  { %1787 = vpow2.f32 %v650_v49  ;;  %v522_v52 = vadd.f32 %v1684_v18, %v389_v51  ;;  %v877_v58 = vadd.f32 %v1720_v19, %v389_v51 }
 0x329   :  { %1789 = vpow2.f32 %v632_v61  ;;  %v1117_v61 = vld [vmem:[#allocation5 + $0x18] sm:$0xff] }
 0x32a   :  { %1703 = vmatprep.subr.msk.mxu0 %vm621_vm6, %v522_v52  ;;  %1791 = vpow2.f32 %v634_v62 }
 0x32b   :  { %1704 = vmatpush3.xpose.msk.msra.mxu0 %vm621_vm6, %v522_v52  ;;  %v1009_v52 = vld [vmem:[#allocation4 + $0x18] sm:$0xff] }
 0x32c   :  { %1705 = vmatprep.subr.msk.mxu0 %vm621_vm6, %v517_v53 }
 0x32f   :  { %1706 = vmatpush3.xpose.msk.msra.mxu0 %vm621_vm6, %v517_v53  ;;  %v1008_v53 = vld [vmem:[#allocation4 + $0x10] sm:$0xff] }
 0x330   :  { %1735 = vmatprep.subr.msk.mxu0 %vm621_vm6, %v887_v54 }
 0x331   :  { %v1786_v55 = vpop.eup %1785 }
 0x332   :  { %1707 = vmatprep.mubr.msk.f32.mxu0 %vm621_vm6, %v1786_v55  ;;  %v656_v59 = vsel %vm621_vm6, %v1786_v55, 0.0 }
 0x335   :  { %v1788_v56 = vpop.eup %1787 }
 0x336   :  { %1708 = vmatmul.mubr.msk.f32.vlgmr.msra.gmra.mxu0 %vm621_vm6, %v1788_v56  ;;  %v659_v57 = vsel %vm621_vm6, %v1788_v56, 0.0  ;;  %v1790_v7 = vpop.eup %1789 }
 0x337   :  { %1736 = vmatpush3.xpose.msk.msra.mxu0 %vm621_vm6, %v887_v54  ;;  %660 = vadd.xlane.f32.xlu0 %v659_v57  ;;  %v1792_v8 = vpop.eup %1791  ;;  %v654_v14 = vmul.f32 %v1790_v7, %v652_v12 }
 0x338   :  { %1737 = vmatprep.subr.msk.mxu0 %vm621_vm6, %v882_v38  ;;  %v655_v10 = vmul.f32 %v1792_v8, %v653_v9 }
 0x33b   :  { %1738 = vmatpush3.xpose.msk.msra.mxu0 %vm621_vm6, %v882_v38  ;;  %657 = vadd.xlane.f32.xlu0 %v656_v59 }
 0x33c   :  { %1739 = vmatprep.subr.msk.mxu0 %vm621_vm6, %v877_v58 }
 0x33f   :  { %1740 = vmatpush3.xpose.msk.msra.mxu0 %vm621_vm6, %v877_v58 }
 0x340   :  { %1741 = vmatprep.subr.msk.mxu0 %vm621_vm6, %v872_v60 }
 0x343   :  { %1742 = vmatpush3.xpose.msk.msra.mxu0 %vm621_vm6, %v872_v60 }
 0x372   :  { %v982_v0 = vpop.xlane.xlu1 %981 }
 0x373   :  { %v984_v2 = vmax.f32 %v2126_v63, %v982_v0 }
 0x374   :  { %v979_v3 = vpop.xlane.xlu0 %978 }
 0x375   :  { %v986_v4 = vsub.f32 %v2126_v63, %v984_v2  ;;  %1135 = vst.msk [vmem:[#allocation3 + $0x18] sm:$0xff] %vm331_vm5, %v984_v2  ;;  %v983_v5 = vmax.f32 %v975_v1, %v979_v3  ;;  %998 = vperm.xlu0 %1783, %v984_v2   ;;  %v1116_v63 = vld [vmem:[#allocation5 + $0x10] sm:$0xff] }
 0x377   :  { %v985_v6 = vsub.f32 %v975_v1, %v983_v5  ;;  %1134 = vst.msk [vmem:[#allocation3 + $0x10] sm:$0xff] %vm331_vm5, %v983_v5  ;;  %993 = vperm.xlu1 %1784, %v983_v5   ;;  %v989_v43 = vmul.f32 1.442695, %v986_v4 }
 0x379   :  { %v987_v39 = vmul.f32 1.442695, %v985_v6 }
 0x37b   :  { %764 = vperm.xlu1 %1784, %v1790_v7  }
 0x37f   :  { %769 = vperm.xlu1 %1784, %v1792_v8  }
 0x3c0   :  { %v661_v11 = vpop.xlane.xlu0 %660 }
 0x3c1   :  { %v663_v13 = vadd.f32 %v661_v11, %v655_v10 }
 0x3c3   :  { %666 = vst.msk [vmem:[#allocation4 + $0x8] sm:$0xff] %vm331_vm5, %v663_v13 }
 0x3c4   :  { %v658_v15 = vpop.xlane.xlu0 %657 }
 0x3c5   :  { %v662_v16 = vadd.f32 %v658_v15, %v654_v14 }
 0x3c7   :  { %665 = vst.msk [vmem:[#allocation4] sm:$0xff] %vm331_vm5, %v662_v16 }
 0x3ca   :  { %v1152_v18 = vld [vmem:[#allocation4 + $0x8] sm:$0xff] }
 0x3cb   :  { %1793 = vrcp.f32 %v1152_v18 }
 0x3ce   :  { %v1151_v19 = vld [vmem:[#allocation4] sm:$0xff] }
 0x3cf   :  { %1795 = vrcp.f32 %v1151_v19 }
 0x3d8   :  { %v1794_v20 = vpop.eup %1793 }
 0x3d9   :  { %1162 = vperm.xlu1 %1784, %v1794_v20  }
 0x3dc   :  { %v1796_v21 = vpop.eup %1795 }
 0x3dd   :  { %1157 = vperm.xlu0 %1783, %v1796_v21  }
 0x3f0   :  { %v999_v22 = vpop.permute.xlu0 %998 }
 0x3f1   :  { %v1002_v23 = vsub.f32 %v2099_v40, %v999_v22 }
 0x3f2   :  { %v994_v24 = vpop.permute.xlu1 %993 }
 0x3f3   :  { %v1005_v25 = vmul.f32 1.442695, %v1002_v23  ;;  %v1001_v26 = vsub.f32 %v2103_v42, %v994_v24 }
 0x3f5   :  { %1797 = vpow2.f32 %v1005_v25  ;;  %v1003_v28 = vmul.f32 1.442695, %v1001_v26 }
 0x3f6   :  { %v1709_v29 = vpop.f32.mrf.mxu0  ;;  %v765_v30 = vpop.permute.xlu1 %764 }
 0x3f7   :  { %1799 = vpow2.f32 %v1003_v28  ;;  %v772_v31 = vmul.f32 %v765_v30, %v760_v27 }
 0x3f8   :  { %v751_v32 = vpop.f32.mrf.mxu0  ;;  %1801 = vpow2.f32 %v987_v39 }
 0x3f9   :  { %v774_v34 = vadd.f32 %v772_v31, %v751_v32  ;;  %1803 = vpow2.f32 %v989_v43 }
 0x3fa   :  { %v770_v35 = vpop.permute.xlu1 %769 }
 0x3fb   :  { %776 = vst.msk [vmem:[#allocation5] sm:$0xff] %vm203_vm4, %v774_v34  ;;  %v773_v36 = vmul.f32 %v770_v35, %v761_v33 }
 0x3fd   :  { %v775_v37 = vadd.f32 %v1709_v29, %v773_v36 }
 0x3ff   :  { %777 = vst.msk [vmem:[#allocation5 + $0x8] sm:$0xff] %vm203_vm4, %v775_v37 }
 0x402   :  { %v1798_v38 = vpop.eup %1797  ;;  %v1149_v46 = vld [vmem:[#allocation5] sm:$0xff] }
 0x403   :  { %v1015_v40 = vsel %vm621_vm6, %v1798_v38, 0.0 }
 0x404   :  { %v1800_v41 = vpop.eup %1799  ;;  %1016 = vadd.xlane.f32.xlu1 %v1015_v40 }
 0x405   :  { %1743 = vmatprep.mubr.msk.f32.mxu0 %vm621_vm6, %v1800_v41  ;;  %v1012_v42 = vsel %vm621_vm6, %v1800_v41, 0.0  ;;  %v1802_v44 = vpop.eup %1801 }
 0x406   :  { %1744 = vmatmul.mubr.msk.f32.vlgmr.msra.gmra.mxu0 %vm621_vm6, %v1798_v38  ;;  %1013 = vadd.xlane.f32.xlu0 %v1012_v42  ;;  %v1804_v45 = vpop.eup %1803  ;;  %v1150_v50 = vld [vmem:[#allocation5 + $0x8] sm:$0xff]  ;;  %v1010_v57 = vmul.f32 %v1802_v44, %v1008_v53 }
 0x407   :  { %v1011_v54 = vmul.f32 %v1804_v45, %v1009_v52 }
 0x415   :  { %1120 = vperm.xlu1 %1784, %v1802_v44  }
 0x419   :  { %1125 = vperm.xlu1 %1784, %v1804_v45  }
 0x454   :  { %v1163_v49 = vpop.permute.xlu1 %1162 }
 0x455   :  { %v1166_v51 = vmul.f32 %v1163_v49, %v1150_v50 }
 0x458   :  { %v1158_v47 = vpop.permute.xlu0 %1157 }
 0x459   :  { %v1165_v48 = vmul.f32 %v1158_v47, %v1149_v46 }
 0x45b   :  { %1167 = vxpose.xlu0.b32.start [1/2] (short) (narrow) %v1165_v48, 32 }
 0x45f   :  { %1168 = vxpose.xlu0.b32.end [2/2] (short) (narrow) %v1166_v51, 32 }
 0x48d   :  { %v1017_v55 = vpop.xlane.xlu1 %1016 }
 0x48e   :  { %v1019_v56 = vadd.f32 %v1017_v55, %v1011_v54 }
 0x48f   :  { %v1014_v58 = vpop.xlane.xlu0 %1013 }
 0x490   :  { %1021 = vst.msk [vmem:[#allocation4 + $0x18] sm:$0xff] %vm331_vm5, %v1019_v56  ;;  %v1018_v59 = vadd.f32 %v1014_v58, %v1010_v57 }
 0x491   :  { %v1121_v60 = vpop.permute.xlu1 %1120 }
 0x492   :  { %1020 = vst.msk [vmem:[#allocation4 + $0x10] sm:$0xff] %vm331_vm5, %v1018_v59  ;;  %v1128_v2 = vmul.f32 %v1121_v60, %v1116_v63 }
 0x495   :  { %v1126_v62 = vpop.permute.xlu1 %1125 }
 0x496   :  { %v1129_v0 = vmul.f32 %v1126_v62, %v1117_v61 }
 0x497   :  { %v1347_v19 = vld [vmem:[#allocation4 + $0x18] sm:$0xff] }
 0x499   :  { %v1346_v18 = vld [vmem:[#allocation4 + $0x10] sm:$0xff] }
 0x49a   :  { %1805 = vrcp.f32 %v1346_v18  ;;  %v2175_v18 = vld [vmem:[%s2274_s6 + $0x18] sm:$0xff] }
 0x49b   :  { %1807 = vrcp.f32 %v1347_v19  ;;  %v2180_v19 = vld [vmem:[%s2274_s6 + $0x10] sm:$0xff] }
 0x4a7   :  { %v1806_v20 = vpop.eup %1805 }
 0x4a8   :  { %v1808_v21 = vpop.eup %1807 }
 0x4c6   :  { %v1745_v1 = vpop.f32.mrf.mxu0 }
 0x4c7   :  { %v1131_v3 = vadd.f32 %v1745_v1, %v1129_v0 }
 0x4c8   :  { %v1106_v4 = vpop.f32.mrf.mxu0 }
 0x4c9   :  { %1133 = vst.msk [vmem:[#allocation5 + $0x18] sm:$0xff] %vm203_vm4, %v1131_v3  ;;  %v1130_v5 = vadd.f32 %v1128_v2, %v1106_v4 }
 0x4cb   :  { %1132 = vst.msk [vmem:[#allocation5 + $0x10] sm:$0xff] %vm203_vm4, %v1130_v5 }
 0x4d0   :  { %v1345_v30 = vld [vmem:[#allocation5 + $0x18] sm:$0xff] }
 0x4d2   :  { %v1344_v25 = vld [vmem:[#allocation5 + $0x10] sm:$0xff] }
 0x4d7   :  { %v1183_v6 = vpop.trf.xlu0 }
 0x4d8   :  { %v1200_v10 = vsel %vm1199_vm7, %v1183_v6, 0.0 }
 0x4db   :  { %v1184_v7 = vpop.trf.xlu0 }
 0x4dc   :  { %v1201_v8 = vsel %vm1199_vm7, %v1184_v7, 0.0 }
 0x4dd   :  { %v1202_v12 = vadd.f32 %v1201_v8, %v1200_v10 }
 0x4df   :  { %v1185_v9 = vpop.trf.xlu0 }
 0x4e0   :  { %v1203_v11 = vsel %vm1199_vm7, %v1185_v9, 0.0 }
 0x4e1   :  { %v1204_v13 = vadd.f32 %v1203_v11, %v1202_v12 }
 0x4e3   :  { %v1186_v14 = vpop.trf.xlu0 }
 0x4e4   :  { %v1205_v15 = vsel %vm1199_vm7, %v1186_v14, 0.0 }
 0x4e5   :  { %v1206_v16 = vadd.f32 %v1205_v15, %v1204_v13 }
 0x4e7   :  { %1207 = vadd.xlane.f32.xlu1 %v1206_v16 }
 0x4f8   :  { %1352 = vperm.xlu1 %1784, %v1806_v20   ;;  %v2185_v20 = vld [vmem:[%s2274_s6 + $0x8] sm:$0xff] }
 0x4fc   :  { %1357 = vperm.xlu1 %1784, %v1808_v21  }
 0x570   :  { %v1208_v22 = vpop.xlane.xlu1 %1207 }
 0x571   :  { %v1209_v23 = vrot.slane %v1208_v22, 4 }
 0x573   :  { %v1210_v24 = vadd.f32 %v1209_v23, %v1208_v22 }
 0x574   :  { %v1353_v26 = vpop.permute.xlu1 %1352 }
 0x575   :  { %v1211_v27 = vrot.slane %v1210_v24, 2  ;;  %v1360_v28 = vmul.f32 %v1353_v26, %v1344_v25  ;;  %v2190_v25 = vld [vmem:[%s2275_s7 + $0x18] sm:$0xff]  ;;  %v2195_v26 = vld [vmem:[%s2275_s7 + $0x10] sm:$0xff] }
 0x577   :  { %1362 = vxpose.xlu1.b32.start [1/2] (short) (narrow) %v1360_v28, 32  ;;  %v1212_v29 = vadd.f32 %v1211_v27, %v1210_v24  ;;  %v2200_v27 = vld [vmem:[%s2274_s6] sm:$0xff] }
 0x578   :  { %v1358_v31 = vpop.permute.xlu1 %1357 }
 0x579   :  { %v1361_v32 = vmul.f32 %v1358_v31, %v1345_v30  ;;  %v1213_v33 = vrot.slane %v1212_v29, 1  ;;  %v2208_v31 = vld [vmem:[%s2275_s7 + $0x8] sm:$0xff] }
 0x57b   :  { %1363 = vxpose.xlu1.b32.end [2/2] (short) (narrow) %v1361_v32, 32  ;;  %v1214_v34 = vadd.f32 %v1213_v33, %v1212_v29 }
 0x57d   :  { %1768 = vpush %v1214_v34 }
 0x5ae   :  { %s1769_s5 = spop %1768 }
 0x5af   :  { %v1216_v35 = vstv %s1769_s5  ;;  %s1536_s5 = sshll.u32 %s1839_s23, 4  ;;  %s1537_s5 = int_to_ptr.vmem [resolvable:$true] %s1536_s5 }
 0x5b0   :  { %v1217_v36 = vmul.f32 0.001953125, %v1216_v35  ;;  %v2216_v35 = vld [vmem:[%s2275_s7] sm:$0xff]  ;;  %p1818_p1 = scmp.lt.s32.totalorder %s1537_s5, %s1537_s5 }
 0x5b2   :  { %v1218_v37 = vsub.f32 %v1183_v6, %v1217_v36  ;;  %v1219_v38 = vsub.f32 %v1184_v7, %v1217_v36  ;;  %v1220_v39 = vsub.f32 %v1185_v9, %v1217_v36  ;;  %v1221_v40 = vsub.f32 %v1186_v14, %v1217_v36 }
 0x5b4   :  { %v1222_v41 = vmul.f32 %v1218_v37, %v1218_v37  ;;  %v1223_v42 = vmul.f32 %v1219_v38, %v1219_v38  ;;  %v1224_v43 = vmul.f32 %v1220_v39, %v1220_v39  ;;  %v1225_v44 = vmul.f32 %v1221_v40, %v1221_v40 }
 0x5b6   :  { %v1226_v45 = vsel %vm1199_vm7, %v1222_v41, 0.0  ;;  %v1227_v46 = vsel %vm1199_vm7, %v1223_v42, 0.0  ;;  %v1229_v48 = vsel %vm1199_vm7, %v1224_v43, 0.0  ;;  %v1231_v50 = vsel %vm1199_vm7, %v1225_v44, 0.0  ;;  %v2225_v42 = vld [vmem:[%s2276_s8] sm:$0xf] }
 0x5b7   :  { %v1228_v47 = vadd.f32 %v1227_v46, %v1226_v45 }
 0x5b9   :  { %v1230_v49 = vadd.f32 %v1229_v48, %v1228_v47 }
 0x5bb   :  { %v1232_v51 = vadd.f32 %v1231_v50, %v1230_v49 }
 0x5bd   :  { %1233 = vadd.xlane.f32.xlu0 %v1232_v51 }
 0x5f3   :  { %v2154_v52 = vpop.trf.xlu1 }
 0x5f4   :  { %v1394_v56 = vsel %vm1199_vm7, %v2154_v52, 0.0 }
 0x5f7   :  { %v2156_v53 = vpop.trf.xlu1 }
 0x5f8   :  { %v1395_v54 = vsel %vm1199_vm7, %v2156_v53, 0.0 }
 0x5f9   :  { %v1396_v58 = vadd.f32 %v1395_v54, %v1394_v56 }
 0x5fb   :  { %v2160_v55 = vpop.trf.xlu1 }
 0x5fc   :  { %v1397_v57 = vsel %vm1199_vm7, %v2160_v55, 0.0 }
 0x5fd   :  { %v1398_v59 = vadd.f32 %v1397_v57, %v1396_v58 }
 0x5ff   :  { %v2166_v60 = vpop.trf.xlu1 }
 0x600   :  { %v1399_v61 = vsel %vm1199_vm7, %v2166_v60, 0.0 }
 0x601   :  { %v1400_v62 = vadd.f32 %v1399_v61, %v1398_v59 }
 0x603   :  { %1401 = vadd.xlane.f32.xlu1 %v1400_v62 }
 0x646   :  { %v1234_v63 = vpop.xlane.xlu0 %1233 }
 0x647   :  { %v1235_v0 = vrot.slane %v1234_v63, 4 }
 0x649   :  { %v1236_v1 = vadd.f32 %v1235_v0, %v1234_v63 }
 0x64b   :  { %v1237_v2 = vrot.slane %v1236_v1, 2 }
 0x64d   :  { %v1238_v3 = vadd.f32 %v1237_v2, %v1236_v1 }
 0x64f   :  { %v1239_v4 = vrot.slane %v1238_v3, 1 }
 0x651   :  { %v1240_v5 = vadd.f32 %v1239_v4, %v1238_v3  ;;  %v1340_v4 = vld [vmem:[%s2269_s1] sm:$0xf] }
 0x653   :  { %1770 = vpush %v1240_v5 }
 0x684   :  { %s1771_s24 = spop %1770 }
 0x685   :  { %v1242_v6 = vstv %s1771_s24  ;;  %s1813_s24 = scalar_lea.vmem %s1537_s5, 128 }
 0x686   :  { %v1243_v7 = vmul.f32 0.001953125, %v1242_v6  ;;  %p1814_p0 = scmp.ne.s32.totalorder %s1537_s5, %s1813_s24  ;;  %p1819_p2 = scmp.lt.s32.totalorder %s1813_s24, %s1813_s24 }
 0x688   :  { %v1244_v8 = vadd.f32 1e-05, %v1243_v7  ;;  %p1820_p3 = por %p1819_p2, %p1818_p1 }
 0x68a   :  { %1809 = vrsqrt.f32 %v1244_v8  ;;  %p1821_p4 = pnand %p1820_p3, %p1814_p0 }
 0x68c   :  { %v1402_v9 = vpop.xlane.xlu1 %1401 }
 0x68d   :  { %v1403_v10 = vrot.slane %v1402_v9, 4 }
 0x68f   :  { %v1404_v11 = vadd.f32 %v1403_v10, %v1402_v9 }
 0x691   :  { %v1405_v12 = vrot.slane %v1404_v11, 2 }
 0x693   :  { %v1406_v13 = vadd.f32 %v1405_v12, %v1404_v11 }
 0x695   :  { %v1407_v14 = vrot.slane %v1406_v13, 1 }
 0x697   :  { %v1810_v15 = vpop.eup %1809  ;;  %v1408_v16 = vadd.f32 %v1407_v14, %v1406_v13 }
 0x698   :  { %v1249_v21 = vmul.f32 %v1810_v15, %v1221_v40  ;;  %v1248_v22 = vmul.f32 %v1810_v15, %v1220_v39  ;;  %v1247_v23 = vmul.f32 %v1810_v15, %v1219_v38  ;;  %v1246_v24 = vmul.f32 %v1810_v15, %v1218_v37 }
 0x699   :  { %1772 = vpush %v1408_v16 }
 0x69a   :  { %v1253_v28 = vmul.f32 %v1249_v21, %v2175_v18  ;;  %v1252_v29 = vmul.f32 %v1248_v22, %v2180_v19  ;;  %v1251_v30 = vmul.f32 %v1247_v23, %v2185_v20  ;;  %v1250_v34 = vmul.f32 %v1246_v24, %v2200_v27 }
 0x69c   :  { %v1257_v32 = vadd.f32 %v1253_v28, %v2190_v25  ;;  %v1256_v33 = vadd.f32 %v1252_v29, %v2195_v26  ;;  %v1255_v37 = vadd.f32 %v1251_v30, %v2208_v31  ;;  %v1254_v39 = vadd.f32 %v1250_v34, %v2216_v35 }
 0x69e   :  { %v1261_v36 = vmax.f32 %v1257_v32, 0.0  ;;  %v1260_v38 = vmax.f32 %v1256_v33, 0.0  ;;  %v1259_v40 = vmax.f32 %v1255_v37, 0.0  ;;  %v1258_v41 = vmax.f32 %v1254_v39, 0.0 }
 0x6a0   :  { %1747 = vmatpush3.msra.mxu1 %v1261_v36 }
 0x6a1   :  { %1748 = vmatprep.subr.mxu1 %v1837_v17 }
 0x6a2   :  { %1749 = vmatpush3.msra.mxu1 %v1260_v38 }
 0x6a3   :  { %1750 = vmatprep.subr.mxu1 %v1837_v17 }
 0x6a4   :  { %1751 = vmatpush3.msra.mxu1 %v1259_v40 }
 0x6a5   :  { %1752 = vmatprep.subr.mxu1 %v1837_v17 }
 0x6a6   :  { %1753 = vmatpush3.msra.mxu1 %v1258_v41 }
 0x6a7   :  { %1755 = vmatmul.mubr.msk.f32.vlgmr.msra.gmra.mxu1 %vm203_vm4, %v2225_v42  ;;  %1757 = vmatprep.subr.mxu1 %v1837_v17 }
 0x6a8   :  { %1765 = vmatprep.mubr.msk.f32.mxu1 %vm1838_vm8, %v1837_v17 }
 0x6ca   :  { %s1773_s7 = spop %1772 }
 0x6cb   :  { %v1410_v43 = vstv %s1773_s7 }
 0x6cc   :  { %v1411_v44 = vmul.f32 0.001953125, %v1410_v43 }
 0x6ce   :  { %v1412_v45 = vsub.f32 %v2154_v52, %v1411_v44  ;;  %v1413_v46 = vsub.f32 %v2156_v53, %v1411_v44  ;;  %v1414_v47 = vsub.f32 %v2160_v55, %v1411_v44  ;;  %v1415_v48 = vsub.f32 %v2166_v60, %v1411_v44  ;;  %v1140_v53 = vld [vmem:[%s2277_s9] sm:$0xf] }
 0x6d0   :  { %v1416_v49 = vmul.f32 %v1412_v45, %v1412_v45  ;;  %v1417_v50 = vmul.f32 %v1413_v46, %v1413_v46  ;;  %v1418_v51 = vmul.f32 %v1414_v47, %v1414_v47  ;;  %v1419_v54 = vmul.f32 %v1415_v48, %v1415_v48 }
 0x6d2   :  { %v1420_v56 = vsel %vm1199_vm7, %v1416_v49, 0.0  ;;  %v1421_v57 = vsel %vm1199_vm7, %v1417_v50, 0.0  ;;  %v1423_v59 = vsel %vm1199_vm7, %v1418_v51, 0.0  ;;  %v1425_v52 = vsel %vm1199_vm7, %v1419_v54, 0.0 }
 0x6d3   :  { %v1422_v58 = vadd.f32 %v1421_v57, %v1420_v56 }
 0x6d5   :  { %v1424_v61 = vadd.f32 %v1423_v59, %v1422_v58 }
 0x6d7   :  { %v1426_v62 = vadd.f32 %v1425_v52, %v1424_v61 }
 0x6d9   :  { %1427 = vadd.xlane.f32.xlu0 %v1426_v62 }
 0x6ef   :  { %1264 = vperm.xlu0 %1783, %v1140_v53  }
 0x762   :  { %v1428_v55 = vpop.xlane.xlu0 %1427 }
 0x763   :  { %v1429_v60 = vrot.slane %v1428_v55, 4 }
 0x765   :  { %v1430_v63 = vadd.f32 %v1429_v60, %v1428_v55 }
 0x767   :  { %v1431_v0 = vrot.slane %v1430_v63, 2  ;;  %v1336_v1 = vpop.f32.mrf.mxu1 }
 0x769   :  { %v1432_v2 = vadd.f32 %v1431_v0, %v1430_v63  ;;  %v1756_v3 = vpop.f32.mrf.mxu1 }
 0x76a   :  { %v1265_v5 = vpop.permute.xlu0 %1264 }
 0x76b   :  { %v1337_v6 = vadd.f32 %v1336_v1, %v1265_v5  ;;  %v1433_v7 = vrot.slane %v1432_v2, 1 }
 0x76d   :  { %v1341_v8 = vadd.f32 %v1340_v4, %v1337_v6  ;;  %v1434_v9 = vadd.f32 %v1433_v7, %v1432_v2 }
 0x76f   :  { %1343 = vst.msk [vmem:[#allocation6] sm:$0xf] %vm1342_vm9, %v1341_v8 }
 0x770   :  { %1774 = vpush %v1434_v9 }
 0x7a1   :  { %s1775_s9 = spop %1774 }
 0x7a2   :  { %v1436_v10 = vstv %s1775_s9 }
 0x7a3   :  { %v1437_v11 = vmul.f32 0.001953125, %v1436_v10 }
 0x7a5   :  { %v1438_v12 = vadd.f32 1e-05, %v1437_v11 }
 0x7a7   :  { %1811 = vrsqrt.f32 %v1438_v12 }
 0x7b4   :  { %v1812_v13 = vpop.eup %1811 }
 0x7b5   :  { %v1443_v14 = vmul.f32 %v1812_v13, %v1415_v48  ;;  %v1442_v15 = vmul.f32 %v1812_v13, %v1414_v47  ;;  %v1441_v16 = vmul.f32 %v1812_v13, %v1413_v46  ;;  %v1440_v21 = vmul.f32 %v1812_v13, %v1412_v45 }
 0x7b7   :  { %v1447_v22 = vmul.f32 %v1443_v14, %v2175_v18  ;;  %v1446_v23 = vmul.f32 %v1442_v15, %v2180_v19  ;;  %v1445_v24 = vmul.f32 %v1441_v16, %v2185_v20  ;;  %v1444_v30 = vmul.f32 %v1440_v21, %v2200_v27 }
 0x7b9   :  { %v1451_v28 = vadd.f32 %v1447_v22, %v2190_v25  ;;  %v1450_v29 = vadd.f32 %v1446_v23, %v2195_v26  ;;  %v1449_v33 = vadd.f32 %v1445_v24, %v2208_v31  ;;  %v1448_v36 = vadd.f32 %v1444_v30, %v2216_v35  ;;  %v1595_v25 = vld [vmem:[%s2269_s1 + $0x4] sm:$0xf] }
 0x7bb   :  { %v1455_v32 = vmax.f32 %v1451_v28, 0.0  ;;  %v1454_v34 = vmax.f32 %v1450_v29, 0.0  ;;  %v1453_v18 = vmax.f32 %v1449_v33, 0.0  ;;  %v1452_v19 = vmax.f32 %v1448_v36, 0.0 }
 0x7bd   :  { %1758 = vmatpush3.msra.mxu1 %v1455_v32 }
 0x7be   :  { %1759 = vmatprep.subr.mxu1 %v1837_v17 }
 0x7bf   :  { %1760 = vmatpush3.msra.mxu1 %v1454_v34 }
 0x7c0   :  { %1761 = vmatprep.subr.mxu1 %v1837_v17 }
 0x7c1   :  { %1762 = vmatpush3.msra.mxu1 %v1453_v18 }
 0x7c2   :  { %1763 = vmatprep.subr.mxu1 %v1837_v17 }
 0x7c3   :  { %1764 = vmatpush3.msra.mxu1 %v1452_v19 }
 0x7c4   :  { %1766 = vmatmul.mubr.msk.f32.vlgmr.msra.gmra.mxu1 %vm203_vm4, %v2225_v42 }
 0x884   :  { %v1522_v20 = vpop.f32.mrf.mxu1 }
 0x885   :  { %v1523_v26 = vadd.f32 %v1522_v20, %v1265_v5 }
 0x886   :  { %v1767_v27 = vpop.f32.mrf.mxu1 }
 0x887   :  { %v1528_v31 = vadd.f32 %v1595_v25, %v1523_v26 }
 0x889   :  { %1530 = vst.msk [vmem:[#allocation6 + $0x4] sm:$0xf] %vm1342_vm9, %v1528_v31 }
 0x88a   :  { %1824 = shalt.err (!%p1821_p4)
}
 0x88b   :  { %s1840_s25 = smov 64   ;;  %s1841_s3 = smov 4  }
 0x88c   :  { %1542 = dma.vmem_to_hbm [thread:$0]  %s1537_s5, 128, %s2278_s10, [#allocation7], %s1840_s25, %s1840_s25, %s1841_s3  }
 0x88d   :  { %1833 = dma.done.wait [#allocation7], 128  }
 0x88e   :  { %1834 = vsyncadd [#allocation7], 4294967168 }
 0x88f   :  { %1546 = vsyncpa [#allocation7], 1 }

</bundles_post_ra>
